<compile_context>
chip_gen: v7x
topology: tpu7x:2x2x1
jax: 0.10.0
libtpu: 0.0.40
codegen_flags: <defaults>
</compile_context>

<pallas_src>
import functools

import jax
import jax.numpy as jnp
from jax.experimental import pallas as pl
from jax.experimental.pallas import tpu as pltpu

# ---- module hyper-parameters (from rnn.py) ----
INPUT_SIZE = 1
HIDDEN_SIZE = 50
NUM_LSTM_STACK = 4          # lstm1..lstm4, each nn.LSTM(num_layers=1)
DROPOUT = 0.2               # TODO(synk): dropout is a no-op in eval mode; not applied.

# TPU-friendly padded sizes (padding done once at param-packing time)
HIDDEN_PAD = 128            # lane-aligned: each gate slice is one 128-lane vreg
GATE_DIM = 4 * HIDDEN_PAD   # 512
SUBLANE = 8                 # batch padded to a multiple of 8 sublanes

# packed gate order along the 4H axis: i, f, o, g  (PyTorch row order is i, f, g, o)
_PT_GATE_FOR_PACKED = (0, 1, 3, 2)

# small example sizes
BATCH = 2
SEQ = 8


def _sigmoid(x):
    # single-EUP sigmoid: 0.5 * tanh(0.5 x) + 0.5 (exact identity; avoids exp + divide
    # on the serial per-timestep dependency chain).
    return 0.5 * jnp.tanh(0.5 * x) + 0.5


# ----------------------------------------------------------------------------
# Pallas kernel: one LSTM layer per grid step + final linear head on the last.
# ----------------------------------------------------------------------------
def rnn_regressor_kernel(x_ref, w_ih_ref, w_hh_ref, b_ref, fc_w_ref, fc_b_ref,
                         out_ref, seq_ref, xproj_ref,
                         *, seq_len, batch_pad, hidden_pad):
    # grid axis 0 = layer index (arbitrary / sequential)
    # x_ref     : (T*B_pad, H_pad) f32   layer-0 input, time-major, zero padded
    # w_ih_ref  : (H_pad, 4H_pad)  bf16  gate-fused input->gate weights (i,f,o,g), layer l
    # w_hh_ref  : (H_pad, 4H_pad)  bf16  gate-fused hidden->gate weights, layer l
    # b_ref     : (1, 4H_pad)      f32   b_ih + b_hh, layer l
    # fc_w_ref  : (1, H_pad) f32 ; fc_b_ref : (1, 1) f32
    # out_ref   : (B_pad, 1) f32
    # seq_ref   : VMEM scratch (T*B_pad, H_pad)  f32  layer output sequence (persists)
    # xproj_ref : VMEM scratch (T*B_pad, 4H_pad) f32  hoisted input projection (+bias)
    l = pl.program_id(0)
    h3 = 3 * hidden_pad

    # ---- hoisted input projection (+ fused bias) for the whole sequence ----
    @pl.when(l == 0)
    def _():
        # input_size == 1: only row 0 of W_ih[0] is nonzero -> VPU outer-product
        # broadcast instead of a (T*B_pad,128)@(128,512) matmul that is ~99% zeros.
        x_col = x_ref[:, 0:1]                                  # (T*B_pad, 1)
        w_row = w_ih_ref[0:1, :].astype(jnp.float32)           # (1, 4H_pad)
        xproj_ref[...] = x_col * w_row + b_ref[...]

    @pl.when(l > 0)
    def _():
        xproj_ref[...] = (
            jnp.dot(seq_ref[...].astype(jnp.bfloat16), w_ih_ref[...],
                    preferred_element_type=jnp.float32)
            + b_ref[...])                                      # bias folded in once

    w_hh_l = w_hh_ref[...]            # (H_pad, 4H_pad) bf16, reused every timestep
    # TODO(synk): weight-stationary MXU driving (pltpu.matmul_push_rhs / matmul_acc_lhs /
    # matmul_pop) would keep W_hh resident in the MXU weight regs across the time loop.

    def step(t, carry):
        h, c = carry
        row = pl.multiple_of(t * batch_pad, batch_pad)
        pre = (xproj_ref[pl.ds(row, batch_pad), :]
               + jnp.dot(h.astype(jnp.bfloat16), w_hh_l,
                         preferred_element_type=jnp.float32))
        sig = _sigmoid(pre[:, :h3])                   # fused i|f|o sigmoid
        i_g = sig[:, :hidden_pad]
        f_g = sig[:, hidden_pad:2 * hidden_pad]
        o_g = sig[:, 2 * hidden_pad:]
        g_g = jnp.tanh(pre[:, h3:])
        c = f_g * c + i_g * g_g
        h = o_g * jnp.tanh(c)
        seq_ref[pl.ds(row, batch_pad), :] = h
        return h, c

    zeros = jnp.zeros((batch_pad, hidden_pad), jnp.float32)
    unroll = True if seq_len <= 16 else 8             # bound unroll for long sequences
    h_last, _ = jax.lax.fori_loop(0, seq_len, step, (zeros, zeros), unroll=unroll)
    # dropout between layers: identity (eval mode)

    @pl.when(l == pl.num_programs(0) - 1)
    def _():
        # final Linear(H, 1): VPU multiply + lane reduction (skip an N=1 MXU pass)
        out_ref[...] = (jnp.sum(h_last * fc_w_ref[...], axis=-1, keepdims=True)
                        + fc_b_ref[...])


# ----------------------------------------------------------------------------
# Parameter construction (deterministic, PyTorch-style uniform init) + packing
# ----------------------------------------------------------------------------
def init_params(key, input_size=INPUT_SIZE, hidden=HIDDEN_SIZE,
                num_layers=NUM_LSTM_STACK):
    """Raw PyTorch-layout weights: W_ih (4H,in), W_hh (4H,H), b_ih, b_hh."""
    bound = 1.0 / jnp.sqrt(jnp.float32(hidden))
    keys = jax.random.split(key, num_layers * 4 + 2)
    layers = []
    for l in range(num_layers):
        in_dim = input_size if l == 0 else hidden
        k_wih, k_whh, k_bih, k_bhh = keys[4 * l:4 * l + 4]
        layers.append(dict(
            W_ih=jax.random.uniform(k_wih, (4 * hidden, in_dim),
                                    jnp.float32, -bound, bound),
            W_hh=jax.random.uniform(k_whh, (4 * hidden, hidden),
                                    jnp.float32, -bound, bound),
            b_ih=jax.random.uniform(k_bih, (4 * hidden,), jnp.float32, -bound, bound),
            b_hh=jax.random.uniform(k_bhh, (4 * hidden,), jnp.float32, -bound, bound),
        ))
    k_fcw, k_fcb = keys[-2:]
    fc_w = jax.random.uniform(k_fcw, (1, hidden), jnp.float32, -bound, bound)
    fc_b = jax.random.uniform(k_fcb, (1,), jnp.float32, -bound, bound)
    return layers, fc_w, fc_b


def pack_params(layers, fc_w, fc_b, hidden=HIDDEN_SIZE, hidden_pad=HIDDEN_PAD):
    """Gate-fused, transposed, zero-padded weights for the kernel.

    Zero padding is exact: padded hidden units get pre-activation 0
    (i=f=o=0.5, g=0), and with c0=0 they stay identically 0 through time; the
    padded fc weight lanes are 0, so the regression output is unchanged.
    W_ih / W_hh are stored in bf16 (MXU-native operands); biases / fc stay f32.
    """
    w_ih, w_hh, b = [], [], []
    for lp in layers:
        in_dim = lp["W_ih"].shape[1]
        Wih = jnp.zeros((hidden_pad, 4 * hidden_pad), jnp.float32)
        Whh = jnp.zeros((hidden_pad, 4 * hidden_pad), jnp.float32)
        bb = jnp.zeros((1, 4 * hidden_pad), jnp.float32)
        for k, g in enumerate(_PT_GATE_FOR_PACKED):      # packed order i,f,o,g
            rows = slice(g * hidden, (g + 1) * hidden)
            cols = slice(k * hidden_pad, k * hidden_pad + hidden)
            Wih = Wih.at[:in_dim, cols].set(lp["W_ih"][rows, :].T)
            Whh = Whh.at[:hidden, cols].set(lp["W_hh"][rows, :].T)
            bb = bb.at[0, cols].set(lp["b_ih"][rows] + lp["b_hh"][rows])
        w_ih.append(Wih)
        w_hh.append(Whh)
        b.append(bb)
    fc_w_row = jnp.zeros((1, hidden_pad), jnp.float32).at[0, :hidden].set(fc_w[0])
    return dict(
        w_ih=jnp.stack(w_ih).astype(jnp.bfloat16),   # (L, H_pad, 4H_pad) bf16
        w_hh=jnp.stack(w_hh).astype(jnp.bfloat16),   # (L, H_pad, 4H_pad) bf16
        b=jnp.stack(b),                              # (L, 1, 4H_pad)    f32
        fc_w=fc_w_row,                               # (1, H_pad)        f32
        fc_b=fc_b.reshape(1, 1),                     # (1, 1)            f32
    )


# ----------------------------------------------------------------------------
# Wrapper
# ----------------------------------------------------------------------------
@jax.jit
def rnn_regressor_forward(x, params):
    # x: (B, T, input_size) batch-first, like the PyTorch module.
    B, T, F = x.shape
    B_pad = ((B + SUBLANE - 1) // SUBLANE) * SUBLANE
    x = x.astype(jnp.float32)
    # time-major, pad batch -> B_pad and features -> H_pad, flatten time into rows
    x_tm = jnp.transpose(x, (1, 0, 2))                                    # (T, B, F)
    x_pad = jnp.zeros((T, B_pad, HIDDEN_PAD), jnp.float32).at[:, :B, :F].set(x_tm)
    rows = T * B_pad
    x_flat = x_pad.reshape(rows, HIDDEN_PAD)                              # (T*B_pad, H_pad)

    kernel = functools.partial(
        rnn_regressor_kernel, seq_len=T, batch_pad=B_pad, hidden_pad=HIDDEN_PAD)

    # VMEM budget: f32 scratch (seq + xproj) + double-buffered bf16 layer weights
    # + resident x + slack.  Explicit so the same config also fits v5e's 16 MiB
    # default scoped VMEM / v7x's 64 MiB physical VMEM.
    # TODO(synk): for long sequences compute xproj in time-chunks (and/or bf16
    # scratch) instead of one (T*B_pad, 4H_pad) slab.
    vmem_bytes = (rows * (HIDDEN_PAD + GATE_DIM) * 4        # seq + xproj scratch (f32)
                  + 2 * 2 * HIDDEN_PAD * GATE_DIM * 2       # w_ih + w_hh, 2 bufs, bf16
                  + rows * HIDDEN_PAD * 4                   # x resident
                  + (1 << 20))                              # biases / fc / out + slack
    vmem_limit = min(int(vmem_bytes * 2), 96 * 1024 * 1024)

    # TODO(synk): for real batch sizes add a leading "parallel" batch-block grid
    # axis (multiples of 8 rows) so v7x's second TensorCore is used.
    out_pad = pl.pallas_call(
        kernel,
        out_shape=jax.ShapeDtypeStruct((B_pad, 1), jnp.float32),
        grid=(NUM_LSTM_STACK,),
        in_specs=[
            pl.BlockSpec((rows, HIDDEN_PAD), lambda l: (0, 0)),                # x
            pl.BlockSpec((None, HIDDEN_PAD, GATE_DIM), lambda l: (l, 0, 0)),   # w_ih[l]
            pl.BlockSpec((None, HIDDEN_PAD, GATE_DIM), lambda l: (l, 0, 0)),   # w_hh[l]
            pl.BlockSpec((None, 1, GATE_DIM), lambda l: (l, 0, 0)),            # b[l]
            pl.BlockSpec((1, HIDDEN_PAD), lambda l: (0, 0)),                   # fc_w
            pl.BlockSpec((1, 1), lambda l: (0, 0)),                            # fc_b
        ],
        out_specs=pl.BlockSpec((B_pad, 1), lambda l: (0, 0)),
        scratch_shapes=[
            pltpu.VMEM((rows, HIDDEN_PAD), jnp.float32),   # layer output sequence
            pltpu.VMEM((rows, GATE_DIM), jnp.float32),     # hoisted x@W_ih + b
        ],
        compiler_params=pltpu.CompilerParams(
            dimension_semantics=("arbitrary",),
            vmem_limit_bytes=vmem_limit),
    )(x_flat, params["w_ih"], params["w_hh"], params["b"],
      params["fc_w"], params["fc_b"])
    return out_pad[:B]


# ----------------------------------------------------------------------------
# Pure-JAX reference with PyTorch nn.LSTM semantics (raw, unpacked f32 weights)
# ----------------------------------------------------------------------------
def reference_forward(x, layers, fc_w, fc_b, hidden=HIDDEN_SIZE):
    B, T, _ = x.shape
    out = x.astype(jnp.float32)                      # (B, T, in)
    for lp in layers:
        h = jnp.zeros((B, hidden), jnp.float32)
        c = jnp.zeros((B, hidden), jnp.float32)
        ys = []
        for t in range(T):
            gates = (out[:, t, :] @ lp["W_ih"].T + h @ lp["W_hh"].T
                     + lp["b_ih"] + lp["b_hh"])
            i_g = jax.nn.sigmoid(gates[:, 0 * hidden:1 * hidden])
            f_g = jax.nn.sigmoid(gates[:, 1 * hidden:2 * hidden])
            g_g = jnp.tanh(gates[:, 2 * hidden:3 * hidden])
            o_g = jax.nn.sigmoid(gates[:, 3 * hidden:4 * hidden])
            c = f_g * c + i_g * g_g
            h = o_g * jnp.tanh(c)
            ys.append(h)
        out = jnp.stack(ys, axis=1)                  # dropout: identity (eval)
    return out[:, -1, :] @ fc_w.T + fc_b             # (B, 1)


if __name__ == "__main__":
    key = jax.random.PRNGKey(0)
    k_param, k_x = jax.random.split(key)
    raw_layers, fc_w, fc_b = init_params(k_param)
    packed = pack_params(raw_layers, fc_w, fc_b)
    x = jax.random.normal(k_x, (BATCH, SEQ, INPUT_SIZE), jnp.float32)

    out = rnn_regressor_forward(x, packed)
    out = jax.block_until_ready(out)

    ref = reference_forward(x, raw_layers, fc_w, fc_b)
    assert out.shape == (BATCH, 1)
    # bf16 MXU operands -> loosened tolerance vs. the pure-f32 reference
    assert jnp.allclose(out, ref, atol=5e-2, rtol=5e-2), (out, ref)

    print("KERNEL_OK")
</pallas_src>

<mosaic_0001>
module attributes {stable_mosaic.version = 11 : i64} {
  func.func @rnn_regressor_kernel(%arg0: i32, %arg1: memref<64x128xf32, #tpu.memory_space<vmem>>, %arg2: memref<1x128x512xbf16, #tpu.memory_space<vmem>>, %arg3: memref<1x128x512xbf16, #tpu.memory_space<vmem>>, %arg4: memref<1x1x512xf32, #tpu.memory_space<vmem>>, %arg5: memref<1x128xf32, #tpu.memory_space<vmem>>, %arg6: memref<1x1xf32, #tpu.memory_space<vmem>>, %arg7: memref<8x1xf32, #tpu.memory_space<vmem>>, %arg8: memref<64x128xf32, #tpu.memory_space<vmem>>, %arg9: memref<64x512xf32, #tpu.memory_space<vmem>>) attributes {dimension_semantics = [#tpu.dimension_semantics<arbitrary>], iteration_bounds = array<i64: 4>, scalar_prefetch = 0 : i64, scratch_operands = 2 : i64, tpu.core_type = #tpu.core_type<tc>, window_params = [{pipeline_mode = #tpu.pipeline_mode<synchronous>, transform_indices = @transform_0, window_bounds = array<i64: 64, 128>}, {transform_indices = @transform_1, window_bounds = array<i64: 1, 128, 512>}, {transform_indices = @transform_2, window_bounds = array<i64: 1, 128, 512>}, {transform_indices = @transform_3, window_bounds = array<i64: 1, 1, 512>}, {pipeline_mode = #tpu.pipeline_mode<synchronous>, transform_indices = @transform_4, window_bounds = array<i64: 1, 128>}, {pipeline_mode = #tpu.pipeline_mode<synchronous>, transform_indices = @transform_5, window_bounds = array<i64: 1, 1>}, {pipeline_mode = #tpu.pipeline_mode<synchronous>, transform_indices = @transform_6, window_bounds = array<i64: 8, 1>}]} {
    %c0_i32 = arith.constant 0 : i32
    %0 = arith.cmpi eq, %arg0, %c0_i32 : i32
    %1 = arith.extui %0 : i1 to i32
    %c0_i32_0 = arith.constant 0 : i32
    %2 = arith.cmpi ne, %1, %c0_i32_0 : i32
    scf.if %2 {
      %c0_64 = arith.constant 0 : index
      %c0_65 = arith.constant 0 : index
      %228 = vector.load %arg1[%c0_64, %c0_65] : memref<64x128xf32, #tpu.memory_space<vmem>>, vector<64x1xf32>
      %c0_66 = arith.constant 0 : index
      %c0_67 = arith.constant 0 : index
      %c0_68 = arith.constant 0 : index
      %229 = vector.load %arg2[%c0_66, %c0_67, %c0_68] : memref<1x128x512xbf16, #tpu.memory_space<vmem>>, vector<1x1x512xbf16>
      %230 = vector.shape_cast %229 : vector<1x1x512xbf16> to vector<1x512xbf16>
      %231 = arith.extf %230 : vector<1x512xbf16> to vector<1x512xf32>
      %232 = vector.broadcast %228 : vector<64x1xf32> to vector<64x512xf32>
      %233 = vector.broadcast %231 : vector<1x512xf32> to vector<64x512xf32>
      %234 = arith.mulf %232, %233 : vector<64x512xf32>
      %c0_69 = arith.constant 0 : index
      %c0_70 = arith.constant 0 : index
      %c0_71 = arith.constant 0 : index
      %235 = vector.load %arg4[%c0_69, %c0_70, %c0_71] : memref<1x1x512xf32, #tpu.memory_space<vmem>>, vector<1x1x512xf32>
      %236 = vector.shape_cast %235 : vector<1x1x512xf32> to vector<1x512xf32>
      %237 = vector.broadcast %236 : vector<1x512xf32> to vector<64x512xf32>
      %238 = arith.addf %234, %237 : vector<64x512xf32>
      %c0_72 = arith.constant 0 : index
      %c0_73 = arith.constant 0 : index
      %239 = vector.load %arg9[%c0_72, %c0_73] : memref<64x512xf32, #tpu.memory_space<vmem>>, vector<64x512xf32>
      tpu.vector_store %arg9[%c0_72, %c0_73], %238 {strides = array<i32>} : memref<64x512xf32, #tpu.memory_space<vmem>>, vector<64x512xf32>,
    } else {
    }
    %c0_i32_1 = arith.constant 0 : i32
    %3 = arith.cmpi sgt, %arg0, %c0_i32_1 : i32
    %4 = arith.extui %3 : i1 to i32
    %c0_i32_2 = arith.constant 0 : i32
    %5 = arith.cmpi ne, %4, %c0_i32_2 : i32
    scf.if %5 {
      %c0_64 = arith.constant 0 : index
      %c0_65 = arith.constant 0 : index
      %228 = vector.load %arg8[%c0_64, %c0_65] : memref<64x128xf32, #tpu.memory_space<vmem>>, vector<64x128xf32>
      %229 = arith.truncf %228 : vector<64x128xf32> to vector<64x128xbf16>
      %c0_66 = arith.constant 0 : index
      %c0_67 = arith.constant 0 : index
      %c0_68 = arith.constant 0 : index
      %230 = vector.load %arg2[%c0_66, %c0_67, %c0_68] : memref<1x128x512xbf16, #tpu.memory_space<vmem>>, vector<1x128x512xbf16>
      %231 = vector.shape_cast %230 : vector<1x128x512xbf16> to vector<128x512xbf16>
      %cst_69 = arith.constant dense<0.000000e+00> : vector<64x512xf32>
      %232 = tpu.matmul %229, %231, %cst_69 {dimension_numbers = #tpu.dot_dimension_numbers<[1], [0], [0], [1], [0, 0, 1, 1], [], []>} : vector<64x128xbf16>, vector<128x512xbf16>, vector<64x512xf32> -> vector<64x512xf32>
      %c0_70 = arith.constant 0 : index
      %c0_71 = arith.constant 0 : index
      %c0_72 = arith.constant 0 : index
      %233 = vector.load %arg4[%c0_70, %c0_71, %c0_72] : memref<1x1x512xf32, #tpu.memory_space<vmem>>, vector<1x1x512xf32>
      %234 = vector.shape_cast %233 : vector<1x1x512xf32> to vector<1x512xf32>
      %235 = vector.broadcast %234 : vector<1x512xf32> to vector<64x512xf32>
      %236 = arith.addf %232, %235 : vector<64x512xf32>
      %c0_73 = arith.constant 0 : index
      %c0_74 = arith.constant 0 : index
      %237 = vector.load %arg9[%c0_73, %c0_74] : memref<64x512xf32, #tpu.memory_space<vmem>>, vector<64x512xf32>
      tpu.vector_store %arg9[%c0_73, %c0_74], %236 {strides = array<i32>} : memref<64x512xf32, #tpu.memory_space<vmem>>, vector<64x512xf32>,
    } else {
    }
    %c0 = arith.constant 0 : index
    %c0_3 = arith.constant 0 : index
    %c0_4 = arith.constant 0 : index
    %6 = vector.load %arg3[%c0, %c0_3, %c0_4] : memref<1x128x512xbf16, #tpu.memory_space<vmem>>, vector<1x128x512xbf16>
    %7 = vector.shape_cast %6 : vector<1x128x512xbf16> to vector<128x512xbf16>
    %cst = arith.constant 0.000000e+00 : f32
    %8 = vector.broadcast %cst : f32 to vector<8x128xf32>
    %c0_i32_5 = arith.constant 0 : i32
    %c8_i32 = arith.constant 8 : i32
    %9 = arith.muli %c0_i32_5, %c8_i32 : i32
    %10 = tpu.assume_multiple %9, 8 : i32
    %11 = arith.index_cast %10 : i32 to index
    %c0_6 = arith.constant 0 : index
    %12 = vector.load %arg9[%11, %c0_6] : memref<64x512xf32, #tpu.memory_space<vmem>>, vector<8x512xf32>
    %13 = arith.truncf %8 : vector<8x128xf32> to vector<8x128xbf16>
    %cst_7 = arith.constant dense<0.000000e+00> : vector<8x512xf32>
    %14 = tpu.matmul %13, %7, %cst_7 {dimension_numbers = #tpu.dot_dimension_numbers<[1], [0], [0], [1], [0, 0, 1, 1], [], []>} : vector<8x128xbf16>, vector<128x512xbf16>, vector<8x512xf32> -> vector<8x512xf32>
    %15 = arith.addf %12, %14 : vector<8x512xf32>
    %16 = vector.extract_strided_slice %15 {offsets = [0, 0], sizes = [8, 384], strides = [1, 1]} : vector<8x512xf32> to vector<8x384xf32>
    %cst_8 = arith.constant 5.000000e-01 : f32
    %17 = vector.broadcast %cst_8 : f32 to vector<8x384xf32>
    %18 = arith.mulf %17, %16 : vector<8x384xf32>
    %19 = math.tanh %18 : vector<8x384xf32>
    %cst_9 = arith.constant 5.000000e-01 : f32
    %20 = vector.broadcast %cst_9 : f32 to vector<8x384xf32>
    %21 = arith.mulf %20, %19 : vector<8x384xf32>
    %cst_10 = arith.constant 5.000000e-01 : f32
    %22 = vector.broadcast %cst_10 : f32 to vector<8x384xf32>
    %23 = arith.addf %21, %22 : vector<8x384xf32>
    %24 = vector.extract_strided_slice %23 {offsets = [0, 0], sizes = [8, 128], strides = [1, 1]} : vector<8x384xf32> to vector<8x128xf32>
    %25 = vector.extract_strided_slice %23 {offsets = [0, 128], sizes = [8, 128], strides = [1, 1]} : vector<8x384xf32> to vector<8x128xf32>
    %26 = vector.extract_strided_slice %23 {offsets = [0, 256], sizes = [8, 128], strides = [1, 1]} : vector<8x384xf32> to vector<8x128xf32>
    %27 = vector.extract_strided_slice %15 {offsets = [0, 384], sizes = [8, 128], strides = [1, 1]} : vector<8x512xf32> to vector<8x128xf32>
    %28 = math.tanh %27 : vector<8x128xf32>
    %29 = arith.mulf %25, %8 : vector<8x128xf32>
    %30 = arith.mulf %24, %28 : vector<8x128xf32>
    %31 = arith.addf %29, %30 : vector<8x128xf32>
    %32 = math.tanh %31 : vector<8x128xf32>
    %33 = arith.mulf %26, %32 : vector<8x128xf32>
    %34 = arith.index_cast %10 : i32 to index
    %c0_11 = arith.constant 0 : index
    %35 = vector.load %arg8[%34, %c0_11] : memref<64x128xf32, #tpu.memory_space<vmem>>, vector<8x128xf32>
    tpu.vector_store %arg8[%34, %c0_11], %33 {strides = array<i32>} : memref<64x128xf32, #tpu.memory_space<vmem>>, vector<8x128xf32>,
    %c1_i32 = arith.constant 1 : i32
    %c8_i32_12 = arith.constant 8 : i32
    %36 = arith.muli %c1_i32, %c8_i32_12 : i32
    %37 = tpu.assume_multiple %36, 8 : i32
    %38 = arith.index_cast %37 : i32 to index
    %c0_13 = arith.constant 0 : index
    %39 = vector.load %arg9[%38, %c0_13] : memref<64x512xf32, #tpu.memory_space<vmem>>, vector<8x512xf32>
    %40 = arith.truncf %33 : vector<8x128xf32> to vector<8x128xbf16>
    %cst_14 = arith.constant dense<0.000000e+00> : vector<8x512xf32>
    %41 = tpu.matmul %40, %7, %cst_14 {dimension_numbers = #tpu.dot_dimension_numbers<[1], [0], [0], [1], [0, 0, 1, 1], [], []>} : vector<8x128xbf16>, vector<128x512xbf16>, vector<8x512xf32> -> vector<8x512xf32>
    %42 = arith.addf %39, %41 : vector<8x512xf32>
    %43 = vector.extract_strided_slice %42 {offsets = [0, 0], sizes = [8, 384], strides = [1, 1]} : vector<8x512xf32> to vector<8x384xf32>
    %cst_15 = arith.constant 5.000000e-01 : f32
    %44 = vector.broadcast %cst_15 : f32 to vector<8x384xf32>
    %45 = arith.mulf %44, %43 : vector<8x384xf32>
    %46 = math.tanh %45 : vector<8x384xf32>
    %cst_16 = arith.constant 5.000000e-01 : f32
    %47 = vector.broadcast %cst_16 : f32 to vector<8x384xf32>
    %48 = arith.mulf %47, %46 : vector<8x384xf32>
    %cst_17 = arith.constant 5.000000e-01 : f32
    %49 = vector.broadcast %cst_17 : f32 to vector<8x384xf32>
    %50 = arith.addf %48, %49 : vector<8x384xf32>
    %51 = vector.extract_strided_slice %50 {offsets = [0, 0], sizes = [8, 128], strides = [1, 1]} : vector<8x384xf32> to vector<8x128xf32>
    %52 = vector.extract_strided_slice %50 {offsets = [0, 128], sizes = [8, 128], strides = [1, 1]} : vector<8x384xf32> to vector<8x128xf32>
    %53 = vector.extract_strided_slice %50 {offsets = [0, 256], sizes = [8, 128], strides = [1, 1]} : vector<8x384xf32> to vector<8x128xf32>
    %54 = vector.extract_strided_slice %42 {offsets = [0, 384], sizes = [8, 128], strides = [1, 1]} : vector<8x512xf32> to vector<8x128xf32>
    %55 = math.tanh %54 : vector<8x128xf32>
    %56 = arith.mulf %52, %31 : vector<8x128xf32>
    %57 = arith.mulf %51, %55 : vector<8x128xf32>
    %58 = arith.addf %56, %57 : vector<8x128xf32>
    %59 = math.tanh %58 : vector<8x128xf32>
    %60 = arith.mulf %53, %59 : vector<8x128xf32>
    %61 = arith.index_cast %37 : i32 to index
    %c0_18 = arith.constant 0 : index
    %62 = vector.load %arg8[%61, %c0_18] : memref<64x128xf32, #tpu.memory_space<vmem>>, vector<8x128xf32>
    tpu.vector_store %arg8[%61, %c0_18], %60 {strides = array<i32>} : memref<64x128xf32, #tpu.memory_space<vmem>>, vector<8x128xf32>,
    %c2_i32 = arith.constant 2 : i32
    %c8_i32_19 = arith.constant 8 : i32
    %63 = arith.muli %c2_i32, %c8_i32_19 : i32
    %64 = tpu.assume_multiple %63, 8 : i32
    %65 = arith.index_cast %64 : i32 to index
    %c0_20 = arith.constant 0 : index
    %66 = vector.load %arg9[%65, %c0_20] : memref<64x512xf32, #tpu.memory_space<vmem>>, vector<8x512xf32>
    %67 = arith.truncf %60 : vector<8x128xf32> to vector<8x128xbf16>
    %cst_21 = arith.constant dense<0.000000e+00> : vector<8x512xf32>
    %68 = tpu.matmul %67, %7, %cst_21 {dimension_numbers = #tpu.dot_dimension_numbers<[1], [0], [0], [1], [0, 0, 1, 1], [], []>} : vector<8x128xbf16>, vector<128x512xbf16>, vector<8x512xf32> -> vector<8x512xf32>
    %69 = arith.addf %66, %68 : vector<8x512xf32>
    %70 = vector.extract_strided_slice %69 {offsets = [0, 0], sizes = [8, 384], strides = [1, 1]} : vector<8x512xf32> to vector<8x384xf32>
    %cst_22 = arith.constant 5.000000e-01 : f32
    %71 = vector.broadcast %cst_22 : f32 to vector<8x384xf32>
    %72 = arith.mulf %71, %70 : vector<8x384xf32>
    %73 = math.tanh %72 : vector<8x384xf32>
    %cst_23 = arith.constant 5.000000e-01 : f32
    %74 = vector.broadcast %cst_23 : f32 to vector<8x384xf32>
    %75 = arith.mulf %74, %73 : vector<8x384xf32>
    %cst_24 = arith.constant 5.000000e-01 : f32
    %76 = vector.broadcast %cst_24 : f32 to vector<8x384xf32>
    %77 = arith.addf %75, %76 : vector<8x384xf32>
    %78 = vector.extract_strided_slice %77 {offsets = [0, 0], sizes = [8, 128], strides = [1, 1]} : vector<8x384xf32> to vector<8x128xf32>
    %79 = vector.extract_strided_slice %77 {offsets = [0, 128], sizes = [8, 128], strides = [1, 1]} : vector<8x384xf32> to vector<8x128xf32>
    %80 = vector.extract_strided_slice %77 {offsets = [0, 256], sizes = [8, 128], strides = [1, 1]} : vector<8x384xf32> to vector<8x128xf32>
    %81 = vector.extract_strided_slice %69 {offsets = [0, 384], sizes = [8, 128], strides = [1, 1]} : vector<8x512xf32> to vector<8x128xf32>
    %82 = math.tanh %81 : vector<8x128xf32>
    %83 = arith.mulf %79, %58 : vector<8x128xf32>
    %84 = arith.mulf %78, %82 : vector<8x128xf32>
    %85 = arith.addf %83, %84 : vector<8x128xf32>
    %86 = math.tanh %85 : vector<8x128xf32>
    %87 = arith.mulf %80, %86 : vector<8x128xf32>
    %88 = arith.index_cast %64 : i32 to index
    %c0_25 = arith.constant 0 : index
    %89 = vector.load %arg8[%88, %c0_25] : memref<64x128xf32, #tpu.memory_space<vmem>>, vector<8x128xf32>
    tpu.vector_store %arg8[%88, %c0_25], %87 {strides = array<i32>} : memref<64x128xf32, #tpu.memory_space<vmem>>, vector<8x128xf32>,
    %c3_i32 = arith.constant 3 : i32
    %c8_i32_26 = arith.constant 8 : i32
    %90 = arith.muli %c3_i32, %c8_i32_26 : i32
    %91 = tpu.assume_multiple %90, 8 : i32
    %92 = arith.index_cast %91 : i32 to index
    %c0_27 = arith.constant 0 : index
    %93 = vector.load %arg9[%92, %c0_27] : memref<64x512xf32, #tpu.memory_space<vmem>>, vector<8x512xf32>
    %94 = arith.truncf %87 : vector<8x128xf32> to vector<8x128xbf16>
    %cst_28 = arith.constant dense<0.000000e+00> : vector<8x512xf32>
    %95 = tpu.matmul %94, %7, %cst_28 {dimension_numbers = #tpu.dot_dimension_numbers<[1], [0], [0], [1], [0, 0, 1, 1], [], []>} : vector<8x128xbf16>, vector<128x512xbf16>, vector<8x512xf32> -> vector<8x512xf32>
    %96 = arith.addf %93, %95 : vector<8x512xf32>
    %97 = vector.extract_strided_slice %96 {offsets = [0, 0], sizes = [8, 384], strides = [1, 1]} : vector<8x512xf32> to vector<8x384xf32>
    %cst_29 = arith.constant 5.000000e-01 : f32
    %98 = vector.broadcast %cst_29 : f32 to vector<8x384xf32>
    %99 = arith.mulf %98, %97 : vector<8x384xf32>
    %100 = math.tanh %99 : vector<8x384xf32>
    %cst_30 = arith.constant 5.000000e-01 : f32
    %101 = vector.broadcast %cst_30 : f32 to vector<8x384xf32>
    %102 = arith.mulf %101, %100 : vector<8x384xf32>
    %cst_31 = arith.constant 5.000000e-01 : f32
    %103 = vector.broadcast %cst_31 : f32 to vector<8x384xf32>
    %104 = arith.addf %102, %103 : vector<8x384xf32>
    %105 = vector.extract_strided_slice %104 {offsets = [0, 0], sizes = [8, 128], strides = [1, 1]} : vector<8x384xf32> to vector<8x128xf32>
    %106 = vector.extract_strided_slice %104 {offsets = [0, 128], sizes = [8, 128], strides = [1, 1]} : vector<8x384xf32> to vector<8x128xf32>
    %107 = vector.extract_strided_slice %104 {offsets = [0, 256], sizes = [8, 128], strides = [1, 1]} : vector<8x384xf32> to vector<8x128xf32>
    %108 = vector.extract_strided_slice %96 {offsets = [0, 384], sizes = [8, 128], strides = [1, 1]} : vector<8x512xf32> to vector<8x128xf32>
    %109 = math.tanh %108 : vector<8x128xf32>
    %110 = arith.mulf %106, %85 : vector<8x128xf32>
    %111 = arith.mulf %105, %109 : vector<8x128xf32>
    %112 = arith.addf %110, %111 : vector<8x128xf32>
    %113 = math.tanh %112 : vector<8x128xf32>
    %114 = arith.mulf %107, %113 : vector<8x128xf32>
    %115 = arith.index_cast %91 : i32 to index
    %c0_32 = arith.constant 0 : index
    %116 = vector.load %arg8[%115, %c0_32] : memref<64x128xf32, #tpu.memory_space<vmem>>, vector<8x128xf32>
    tpu.vector_store %arg8[%115, %c0_32], %114 {strides = array<i32>} : memref<64x128xf32, #tpu.memory_space<vmem>>, vector<8x128xf32>,
    %c4_i32 = arith.constant 4 : i32
    %c8_i32_33 = arith.constant 8 : i32
    %117 = arith.muli %c4_i32, %c8_i32_33 : i32
    %118 = tpu.assume_multiple %117, 8 : i32
    %119 = arith.index_cast %118 : i32 to index
    %c0_34 = arith.constant 0 : index
    %120 = vector.load %arg9[%119, %c0_34] : memref<64x512xf32, #tpu.memory_space<vmem>>, vector<8x512xf32>
    %121 = arith.truncf %114 : vector<8x128xf32> to vector<8x128xbf16>
    %cst_35 = arith.constant dense<0.000000e+00> : vector<8x512xf32>
    %122 = tpu.matmul %121, %7, %cst_35 {dimension_numbers = #tpu.dot_dimension_numbers<[1], [0], [0], [1], [0, 0, 1, 1], [], []>} : vector<8x128xbf16>, vector<128x512xbf16>, vector<8x512xf32> -> vector<8x512xf32>
    %123 = arith.addf %120, %122 : vector<8x512xf32>
    %124 = vector.extract_strided_slice %123 {offsets = [0, 0], sizes = [8, 384], strides = [1, 1]} : vector<8x512xf32> to vector<8x384xf32>
    %cst_36 = arith.constant 5.000000e-01 : f32
    %125 = vector.broadcast %cst_36 : f32 to vector<8x384xf32>
    %126 = arith.mulf %125, %124 : vector<8x384xf32>
    %127 = math.tanh %126 : vector<8x384xf32>
    %cst_37 = arith.constant 5.000000e-01 : f32
    %128 = vector.broadcast %cst_37 : f32 to vector<8x384xf32>
    %129 = arith.mulf %128, %127 : vector<8x384xf32>
    %cst_38 = arith.constant 5.000000e-01 : f32
    %130 = vector.broadcast %cst_38 : f32 to vector<8x384xf32>
    %131 = arith.addf %129, %130 : vector<8x384xf32>
    %132 = vector.extract_strided_slice %131 {offsets = [0, 0], sizes = [8, 128], strides = [1, 1]} : vector<8x384xf32> to vector<8x128xf32>
    %133 = vector.extract_strided_slice %131 {offsets = [0, 128], sizes = [8, 128], strides = [1, 1]} : vector<8x384xf32> to vector<8x128xf32>
    %134 = vector.extract_strided_slice %131 {offsets = [0, 256], sizes = [8, 128], strides = [1, 1]} : vector<8x384xf32> to vector<8x128xf32>
    %135 = vector.extract_strided_slice %123 {offsets = [0, 384], sizes = [8, 128], strides = [1, 1]} : vector<8x512xf32> to vector<8x128xf32>
    %136 = math.tanh %135 : vector<8x128xf32>
    %137 = arith.mulf %133, %112 : vector<8x128xf32>
    %138 = arith.mulf %132, %136 : vector<8x128xf32>
    %139 = arith.addf %137, %138 : vector<8x128xf32>
    %140 = math.tanh %139 : vector<8x128xf32>
    %141 = arith.mulf %134, %140 : vector<8x128xf32>
    %142 = arith.index_cast %118 : i32 to index
    %c0_39 = arith.constant 0 : index
    %143 = vector.load %arg8[%142, %c0_39] : memref<64x128xf32, #tpu.memory_space<vmem>>, vector<8x128xf32>
    tpu.vector_store %arg8[%142, %c0_39], %141 {strides = array<i32>} : memref<64x128xf32, #tpu.memory_space<vmem>>, vector<8x128xf32>,
    %c5_i32 = arith.constant 5 : i32
    %c8_i32_40 = arith.constant 8 : i32
    %144 = arith.muli %c5_i32, %c8_i32_40 : i32
    %145 = tpu.assume_multiple %144, 8 : i32
    %146 = arith.index_cast %145 : i32 to index
    %c0_41 = arith.constant 0 : index
    %147 = vector.load %arg9[%146, %c0_41] : memref<64x512xf32, #tpu.memory_space<vmem>>, vector<8x512xf32>
    %148 = arith.truncf %141 : vector<8x128xf32> to vector<8x128xbf16>
    %cst_42 = arith.constant dense<0.000000e+00> : vector<8x512xf32>
    %149 = tpu.matmul %148, %7, %cst_42 {dimension_numbers = #tpu.dot_dimension_numbers<[1], [0], [0], [1], [0, 0, 1, 1], [], []>} : vector<8x128xbf16>, vector<128x512xbf16>, vector<8x512xf32> -> vector<8x512xf32>
    %150 = arith.addf %147, %149 : vector<8x512xf32>
    %151 = vector.extract_strided_slice %150 {offsets = [0, 0], sizes = [8, 384], strides = [1, 1]} : vector<8x512xf32> to vector<8x384xf32>
    %cst_43 = arith.constant 5.000000e-01 : f32
    %152 = vector.broadcast %cst_43 : f32 to vector<8x384xf32>
    %153 = arith.mulf %152, %151 : vector<8x384xf32>
    %154 = math.tanh %153 : vector<8x384xf32>
    %cst_44 = arith.constant 5.000000e-01 : f32
    %155 = vector.broadcast %cst_44 : f32 to vector<8x384xf32>
    %156 = arith.mulf %155, %154 : vector<8x384xf32>
    %cst_45 = arith.constant 5.000000e-01 : f32
    %157 = vector.broadcast %cst_45 : f32 to vector<8x384xf32>
    %158 = arith.addf %156, %157 : vector<8x384xf32>
    %159 = vector.extract_strided_slice %158 {offsets = [0, 0], sizes = [8, 128], strides = [1, 1]} : vector<8x384xf32> to vector<8x128xf32>
    %160 = vector.extract_strided_slice %158 {offsets = [0, 128], sizes = [8, 128], strides = [1, 1]} : vector<8x384xf32> to vector<8x128xf32>
    %161 = vector.extract_strided_slice %158 {offsets = [0, 256], sizes = [8, 128], strides = [1, 1]} : vector<8x384xf32> to vector<8x128xf32>
    %162 = vector.extract_strided_slice %150 {offsets = [0, 384], sizes = [8, 128], strides = [1, 1]} : vector<8x512xf32> to vector<8x128xf32>
    %163 = math.tanh %162 : vector<8x128xf32>
    %164 = arith.mulf %160, %139 : vector<8x128xf32>
    %165 = arith.mulf %159, %163 : vector<8x128xf32>
    %166 = arith.addf %164, %165 : vector<8x128xf32>
    %167 = math.tanh %166 : vector<8x128xf32>
    %168 = arith.mulf %161, %167 : vector<8x128xf32>
    %169 = arith.index_cast %145 : i32 to index
    %c0_46 = arith.constant 0 : index
    %170 = vector.load %arg8[%169, %c0_46] : memref<64x128xf32, #tpu.memory_space<vmem>>, vector<8x128xf32>
    tpu.vector_store %arg8[%169, %c0_46], %168 {strides = array<i32>} : memref<64x128xf32, #tpu.memory_space<vmem>>, vector<8x128xf32>,
    %c6_i32 = arith.constant 6 : i32
    %c8_i32_47 = arith.constant 8 : i32
    %171 = arith.muli %c6_i32, %c8_i32_47 : i32
    %172 = tpu.assume_multiple %171, 8 : i32
    %173 = arith.index_cast %172 : i32 to index
    %c0_48 = arith.constant 0 : index
    %174 = vector.load %arg9[%173, %c0_48] : memref<64x512xf32, #tpu.memory_space<vmem>>, vector<8x512xf32>
    %175 = arith.truncf %168 : vector<8x128xf32> to vector<8x128xbf16>
    %cst_49 = arith.constant dense<0.000000e+00> : vector<8x512xf32>
    %176 = tpu.matmul %175, %7, %cst_49 {dimension_numbers = #tpu.dot_dimension_numbers<[1], [0], [0], [1], [0, 0, 1, 1], [], []>} : vector<8x128xbf16>, vector<128x512xbf16>, vector<8x512xf32> -> vector<8x512xf32>
    %177 = arith.addf %174, %176 : vector<8x512xf32>
    %178 = vector.extract_strided_slice %177 {offsets = [0, 0], sizes = [8, 384], strides = [1, 1]} : vector<8x512xf32> to vector<8x384xf32>
    %cst_50 = arith.constant 5.000000e-01 : f32
    %179 = vector.broadcast %cst_50 : f32 to vector<8x384xf32>
    %180 = arith.mulf %179, %178 : vector<8x384xf32>
    %181 = math.tanh %180 : vector<8x384xf32>
    %cst_51 = arith.constant 5.000000e-01 : f32
    %182 = vector.broadcast %cst_51 : f32 to vector<8x384xf32>
    %183 = arith.mulf %182, %181 : vector<8x384xf32>
    %cst_52 = arith.constant 5.000000e-01 : f32
    %184 = vector.broadcast %cst_52 : f32 to vector<8x384xf32>
    %185 = arith.addf %183, %184 : vector<8x384xf32>
    %186 = vector.extract_strided_slice %185 {offsets = [0, 0], sizes = [8, 128], strides = [1, 1]} : vector<8x384xf32> to vector<8x128xf32>
    %187 = vector.extract_strided_slice %185 {offsets = [0, 128], sizes = [8, 128], strides = [1, 1]} : vector<8x384xf32> to vector<8x128xf32>
    %188 = vector.extract_strided_slice %185 {offsets = [0, 256], sizes = [8, 128], strides = [1, 1]} : vector<8x384xf32> to vector<8x128xf32>
    %189 = vector.extract_strided_slice %177 {offsets = [0, 384], sizes = [8, 128], strides = [1, 1]} : vector<8x512xf32> to vector<8x128xf32>
    %190 = math.tanh %189 : vector<8x128xf32>
    %191 = arith.mulf %187, %166 : vector<8x128xf32>
    %192 = arith.mulf %186, %190 : vector<8x128xf32>
    %193 = arith.addf %191, %192 : vector<8x128xf32>
    %194 = math.tanh %193 : vector<8x128xf32>
    %195 = arith.mulf %188, %194 : vector<8x128xf32>
    %196 = arith.index_cast %172 : i32 to index
    %c0_53 = arith.constant 0 : index
    %197 = vector.load %arg8[%196, %c0_53] : memref<64x128xf32, #tpu.memory_space<vmem>>, vector<8x128xf32>
    tpu.vector_store %arg8[%196, %c0_53], %195 {strides = array<i32>} : memref<64x128xf32, #tpu.memory_space<vmem>>, vector<8x128xf32>,
    %c7_i32 = arith.constant 7 : i32
    %c8_i32_54 = arith.constant 8 : i32
    %198 = arith.muli %c7_i32, %c8_i32_54 : i32
    %199 = tpu.assume_multiple %198, 8 : i32
    %200 = arith.index_cast %199 : i32 to index
    %c0_55 = arith.constant 0 : index
    %201 = vector.load %arg9[%200, %c0_55] : memref<64x512xf32, #tpu.memory_space<vmem>>, vector<8x512xf32>
    %202 = arith.truncf %195 : vector<8x128xf32> to vector<8x128xbf16>
    %cst_56 = arith.constant dense<0.000000e+00> : vector<8x512xf32>
    %203 = tpu.matmul %202, %7, %cst_56 {dimension_numbers = #tpu.dot_dimension_numbers<[1], [0], [0], [1], [0, 0, 1, 1], [], []>} : vector<8x128xbf16>, vector<128x512xbf16>, vector<8x512xf32> -> vector<8x512xf32>
    %204 = arith.addf %201, %203 : vector<8x512xf32>
    %205 = vector.extract_strided_slice %204 {offsets = [0, 0], sizes = [8, 384], strides = [1, 1]} : vector<8x512xf32> to vector<8x384xf32>
    %cst_57 = arith.constant 5.000000e-01 : f32
    %206 = vector.broadcast %cst_57 : f32 to vector<8x384xf32>
    %207 = arith.mulf %206, %205 : vector<8x384xf32>
    %208 = math.tanh %207 : vector<8x384xf32>
    %cst_58 = arith.constant 5.000000e-01 : f32
    %209 = vector.broadcast %cst_58 : f32 to vector<8x384xf32>
    %210 = arith.mulf %209, %208 : vector<8x384xf32>
    %cst_59 = arith.constant 5.000000e-01 : f32
    %211 = vector.broadcast %cst_59 : f32 to vector<8x384xf32>
    %212 = arith.addf %210, %211 : vector<8x384xf32>
    %213 = vector.extract_strided_slice %212 {offsets = [0, 0], sizes = [8, 128], strides = [1, 1]} : vector<8x384xf32> to vector<8x128xf32>
    %214 = vector.extract_strided_slice %212 {offsets = [0, 128], sizes = [8, 128], strides = [1, 1]} : vector<8x384xf32> to vector<8x128xf32>
    %215 = vector.extract_strided_slice %212 {offsets = [0, 256], sizes = [8, 128], strides = [1, 1]} : vector<8x384xf32> to vector<8x128xf32>
    %216 = vector.extract_strided_slice %204 {offsets = [0, 384], sizes = [8, 128], strides = [1, 1]} : vector<8x512xf32> to vector<8x128xf32>
    %217 = math.tanh %216 : vector<8x128xf32>
    %218 = arith.mulf %214, %193 : vector<8x128xf32>
    %219 = arith.mulf %213, %217 : vector<8x128xf32>
    %220 = arith.addf %218, %219 : vector<8x128xf32>
    %221 = math.tanh %220 : vector<8x128xf32>
    %222 = arith.mulf %215, %221 : vector<8x128xf32>
    %223 = arith.index_cast %199 : i32 to index
    %c0_60 = arith.constant 0 : index
    %224 = vector.load %arg8[%223, %c0_60] : memref<64x128xf32, #tpu.memory_space<vmem>>, vector<8x128xf32>
    tpu.vector_store %arg8[%223, %c0_60], %222 {strides = array<i32>} : memref<64x128xf32, #tpu.memory_space<vmem>>, vector<8x128xf32>,
    %c8_i32_61 = arith.constant 8 : i32
    %c3_i32_62 = arith.constant 3 : i32
    %225 = arith.cmpi eq, %arg0, %c3_i32_62 : i32
    %226 = arith.extui %225 : i1 to i32
    %c0_i32_63 = arith.constant 0 : i32
    %227 = arith.cmpi ne, %226, %c0_i32_63 : i32
    scf.if %227 {
      %c0_64 = arith.constant 0 : index
      %c0_65 = arith.constant 0 : index
      %228 = vector.load %arg5[%c0_64, %c0_65] : memref<1x128xf32, #tpu.memory_space<vmem>>, vector<1x128xf32>
      %229 = vector.broadcast %228 : vector<1x128xf32> to vector<8x128xf32>
      %230 = arith.mulf %222, %229 : vector<8x128xf32>
      %cst_66 = arith.constant dense<0.000000e+00> : vector<8xf32>
      %231 = vector.multi_reduction <add>, %230, %cst_66 [1] : vector<8x128xf32> to vector<8xf32>
      %232 = vector.shape_cast %231 : vector<8xf32> to vector<8x1xf32>
      %c0_67 = arith.constant 0 : index
      %c0_68 = arith.constant 0 : index
      %233 = vector.load %arg6[%c0_67, %c0_68] : memref<1x1xf32, #tpu.memory_space<vmem>>, vector<1x1xf32>
      %234 = vector.broadcast %233 : vector<1x1xf32> to vector<8x1xf32>
      %235 = arith.addf %232, %234 : vector<8x1xf32>
      %c0_69 = arith.constant 0 : index
      %c0_70 = arith.constant 0 : index
      %236 = vector.load %arg7[%c0_69, %c0_70] : memref<8x1xf32, #tpu.memory_space<vmem>>, vector<8x1xf32>
      tpu.vector_store %arg7[%c0_69, %c0_70], %235 {strides = array<i32>} : memref<8x1xf32, #tpu.memory_space<vmem>>, vector<8x1xf32>,
    } else {
    }
    return
  }
  func.func @transform_0(%arg0: i32) -> (i32, i32) {
    %c0_i32 = arith.constant 0 : i32
    %c0_i32_0 = arith.constant 0 : i32
    %c0_i32_1 = arith.constant 0 : i32
    return %c0_i32, %c0_i32_0 : i32, i32
  }
  func.func @transform_1(%arg0: i32) -> (i32, i32, i32) {
    %c0_i32 = arith.constant 0 : i32
    %c0_i32_0 = arith.constant 0 : i32
    %c0_i32_1 = arith.constant 0 : i32
    return %arg0, %c0_i32, %c0_i32_0 : i32, i32, i32
  }
  func.func @transform_2(%arg0: i32) -> (i32, i32, i32) {
    %c0_i32 = arith.constant 0 : i32
    %c0_i32_0 = arith.constant 0 : i32
    %c0_i32_1 = arith.constant 0 : i32
    return %arg0, %c0_i32, %c0_i32_0 : i32, i32, i32
  }
  func.func @transform_3(%arg0: i32) -> (i32, i32, i32) {
    %c0_i32 = arith.constant 0 : i32
    %c0_i32_0 = arith.constant 0 : i32
    %c0_i32_1 = arith.constant 0 : i32
    return %arg0, %c0_i32, %c0_i32_0 : i32, i32, i32
  }
  func.func @transform_4(%arg0: i32) -> (i32, i32) {
    %c0_i32 = arith.constant 0 : i32
    %c0_i32_0 = arith.constant 0 : i32
    %c0_i32_1 = arith.constant 0 : i32
    return %c0_i32, %c0_i32_0 : i32, i32
  }
  func.func @transform_5(%arg0: i32) -> (i32, i32) {
    %c0_i32 = arith.constant 0 : i32
    %c0_i32_0 = arith.constant 0 : i32
    %c0_i32_1 = arith.constant 0 : i32
    return %c0_i32, %c0_i32_0 : i32, i32
  }
  func.func @transform_6(%arg0: i32) -> (i32, i32) {
    %c0_i32 = arith.constant 0 : i32
    %c0_i32_0 = arith.constant 0 : i32
    %c0_i32_1 = arith.constant 0 : i32
    return %c0_i32, %c0_i32_0 : i32, i32
  }
}

</mosaic_0001>

<bundles_post_ra>
// kernel: rnn_regressor_forward.1
= control target key start
LH: loop header
LB: loop body
LE: loop exit
PB: predicated region body
PF: predicated region fallthrough
CT: control target
= control target key end

     0   :  { %s3370_s0 = inlined_call_operand.vmem [shape: f32[64,128], index: 0, kind: input, shape index: {}]   ;;  %s3371_s1 = inlined_call_operand.hbm [shape: bf16[4,128,512], index: 1, kind: input, shape index: {}]   ;;  %s3372_s2 = inlined_call_operand.hbm [shape: bf16[4,128,512], index: 2, kind: input, shape index: {}]   ;;  %s3373_s3 = inlined_call_operand.vmem [shape: f32[4,1,512], index: 3, kind: input, shape index: {}]   ;;  %s3374_s4 = inlined_call_operand.vmem [shape: f32[1,128], index: 4, kind: input, shape index: {}]   ;;  %s3375_s5 = inlined_call_operand.<no memory space> [shape: f32[1,1], index: 5, kind: input, shape index: {}]   ;;  %s3376_s6 = inlined_call_operand.vmem [shape: f32[8,1], index: 6, kind: output, shape index: {}]  }
   0x1   :  { %v11_v0 = vstv %s3375_s5 }
   0x2   :  { %12 = vst [vmem:[#allocation4] sm:$0x1] %v11_v0 }
   0x3   :  { %13 = vsyncpa [#allocation6], 0 }
   0x4   :  { %15 = vsyncpa [#allocation6 + $0x1], 0 }
   0x5   :  { %16 = vsyncpa [#allocation8], 0 }
   0x6   :  { %18 = vsyncpa [#allocation8 + $0x1], 0  ;;  %s2605_s23 = smov 0   ;;  %s2607_s24 = smov 0  }
   0x7   :  { %s2609_s25 = smov 0   ;;  %s2611_s26 = smov 0  }
   0x8 LB: > { %s2624_s5 = sadd.s32 4294967295, %s2558_s26   ;;  %s2627_s27 = sadd.s32 1, %s2558_s26   ;;  %s2558_s26 = sphi %s2611_s26, %s3386_s26   ;;  %s2554_s25 = sphi %s2609_s25, %s3385_s25   ;;  %s2550_s24 = sphi %s2607_s24, %s3384_s24   ;;  %s2546_s23 = sphi %s2605_s23, %s3383_s23  }
   0x9   : > { %s49_s28 = ssub.s32 %s2558_s26, %s2627_s27  ;;  %s52_s29 = sadd.s32 1, %s2554_s25 }
   0xa   : > { %p50_p0 = scmp.eq.s32.totalorder %s49_s28, 0  ;;  %p59_p1 = scmp.ne.s32.totalorder %s2554_s25, %s2550_s24 }
   0xb   : > { %p60_p2 = scmp.eq.s32.totalorder %s2558_s26, 0  ;;  %p65_p3 = scmp.ne.s32.totalorder %s2550_s24, %s2546_s23 }
   0xc   : > { %s2637_s30 = scalar_select %p50_p0, %s2554_s25, %s52_s29  }
   0xd   : > { %p61_p4 = por %p60_p2, %p59_p1  ;;  %p66_p5 = scmp.eq.s32.totalorder %s2624_s5, 0 }
   0xe   : > { %p2221_p6 = scmp.lt.s32.totalorder %s2558_s26, 4  ;;  %s2646_s8 = sand.u32 1, %s2554_s25  }
   0xf   : > { %p2641_p7 = por %p66_p5, %p65_p3  ;;  %s2127_s9 = sshll.u32 %s2646_s8, 8 }
  0x10   : > { %s2208_s10 = sshll.u32 %s2558_s26, 12  ;;  %s217_s14 = scalar_lea.vmem [#allocation5], %s2127_s9 }
  0x11   : > { %s3378_s7 = scalar_select %p2641_p7, 1, 0 }
  0x12   : > { %s2655_s13 = scalar_lea.hbm %s3371_s1, %s2208_s10  ;;  %s224_s15 = sshll.u32 %s217_s14, 4  ;;  %s2659_s15 = int_to_ptr.vmem [resolvable:$true] %s224_s15 }
  0x13   : > { %p2661_p8 = pnand %p2221_p6, %p61_p4  ;;  %s214_s17 = scalar_lea.sflag [#allocation6], %s2646_s8 }
  0x14   : > { %s2460_s18 = scalar_lea.hbm %s2655_s13, 4096  ;;  %s2465_s21 = scalar_lea.hbm %s3371_s1, 16384 }
  0x15   : > { %p2461_p10 = scmp.ne.s32.totalorder %s2655_s13, %s2460_s18  ;;  %p2462_p11 = pneg %p2661_p8 }
  0x16   : > { %p2466_p0 = scmp.lt.u32.totalorder %s2655_s13, %s3371_s1  ;;  %p2467_p1 = scmp.lt.u32.totalorder %s2465_s21, %s2460_s18 }
  0x17   : > { %p2463_p12 = pnand %p2462_p11, %p2461_p10  ;;  %p2469_p3 = scmp.lt.u32.totalorder %s2460_s18, %s2655_s13 }
  0x18   : > { %p2468_p2 = por %p2467_p1, %p2466_p0 }
  0x19   : > { %p2464_p13 = pneg %p2463_p12 }
  0x1a   : > { %p2470_p4 = por %p2469_p3, %p2468_p2 }
  0x1c   : > { %p2471_p5 = pnand %p2470_p4, %p2464_p13 }
  0x1e   : > { %2474 = shalt.err (!%p2471_p5)
}
  0x1f   : > { %s2475_s28 = scalar_lea.vmem %s2659_s15, 4096  ;;  %s2560_s29 = smov [#allocation5]  }
  0x20   : > { %p2476_p6 = scmp.ne.s32.totalorder %s2659_s15, %s2475_s28  ;;  %s2480_s11 = sshll.u32 %s2560_s29, 4  ;;  %s2481_s11 = int_to_ptr.vmem [resolvable:$false] %s2480_s11 }
  0x21   : > { %s2482_s12 = scalar_lea.vmem %s2481_s11, 8192  ;;  %p2483_p9 = scmp.lt.s32.totalorder %s2659_s15, %s2481_s11 }
  0x22   : > { %p2478_p10 = pnand %p2476_p6, %p2462_p11  ;;  %p2484_p0 = scmp.lt.s32.totalorder %s2482_s12, %s2475_s28 }
  0x24   : > { %p2479_p12 = pneg %p2478_p10  ;;  %p2485_p1 = por %p2484_p0, %p2483_p9 }
  0x26   : > { %p2486_p2 = pnand %p2485_p1, %p2479_p12 }
  0x28   : > { %2489 = shalt.err (!%p2486_p2)
}
  0x29   : > { %s2561_s14 = smov 256   ;;  %s2562_s18 = smov 16  }
  0x2a   : > { %2217 = dma.hbm_to_vmem [thread:$0]  (!%p2661_p8), %s2655_s13, 4096, %s2659_s15, %s214_s17, %s2561_s14, %s2561_s14, %s2562_s18  }
  0x2b   : > { %p260_p9 = scmp.lt.s32.totalorder %s2558_s26, 5  ;;  %s2703_s21 = scalar_lea.hbm %s3372_s2, %s2208_s10 }
  0x2c   : > { %p3380_p13 = scmp.ge.s32.totalorder %s2558_s26, 1  ;;  %s238_s23 = scalar_lea.vmem [#allocation7], %s2127_s9 }
  0x2d   : > { %s245_s28 = sshll.u32 %s238_s23, 4  ;;  %s235_s13 = scalar_lea.sflag [#allocation8], %s2646_s8  ;;  %s2713_s28 = int_to_ptr.vmem [resolvable:$true] %s245_s28 }
  0x2e   : > { %p2707_p3 = pnand %p3380_p13, %p260_p9  ;;  %s2490_s15 = scalar_lea.hbm %s2703_s21, 4096 }
  0x2f   : > { %p2491_p4 = scmp.ne.s32.totalorder %s2703_s21, %s2490_s15  ;;  %s2495_s17 = scalar_lea.hbm %s3372_s2, 16384 }
  0x30   : > { %p2496_p10 = scmp.lt.u32.totalorder %s2703_s21, %s3372_s2  ;;  %p2497_p12 = scmp.lt.u32.totalorder %s2495_s17, %s2490_s15 }
  0x31   : > { %p2493_p5 = pnand %p2491_p4, %p2462_p11  ;;  %p2499_p1 = scmp.lt.u32.totalorder %s2490_s15, %s2703_s21 }
  0x32   : > { %p2498_p0 = por %p2497_p12, %p2496_p10 }
  0x33   : > { %p2494_p6 = pneg %p2493_p5 }
  0x34   : > { %p2500_p2 = por %p2499_p1, %p2498_p0 }
  0x36   : > { %p2501_p9 = pnand %p2500_p2, %p2494_p6 }
  0x38   : > { %2504 = shalt.err (!%p2501_p9)
}
  0x39   : > { %s2505_s9 = scalar_lea.vmem %s2713_s28, 4096  ;;  %s2563_s12 = smov [#allocation7]  }
  0x3a   : > { %p2506_p13 = scmp.ne.s32.totalorder %s2713_s28, %s2505_s9  ;;  %s2510_s19 = sshll.u32 %s2563_s12, 4  ;;  %s2511_s19 = int_to_ptr.vmem [resolvable:$false] %s2510_s19 }
  0x3b   : > { %s2512_s20 = scalar_lea.vmem %s2511_s19, 8192  ;;  %p2513_p7 = scmp.lt.s32.totalorder %s2713_s28, %s2511_s19 }
  0x3c   : > { %p2508_p4 = pnand %p2506_p13, %p2462_p11  ;;  %p2514_p10 = scmp.lt.s32.totalorder %s2512_s20, %s2505_s9 }
  0x3e   : > { %p2509_p5 = pneg %p2508_p4  ;;  %p2515_p12 = por %p2514_p10, %p2513_p7 }
  0x40   : > { %p2516_p0 = pnand %p2515_p12, %p2509_p5 }
  0x42   : > { %2519 = shalt.err (!%p2516_p0)
}
  0x43   : > { %2220 = dma.hbm_to_vmem [thread:$0]  (!%p2661_p8), %s2703_s21, 4096, %s2713_s28, %s235_s13, %s2561_s14, %s2561_s14, %s2562_s18  }
  0x44   : > { %264 = sbr.rel (%p2707_p3) target bundleno = 2696 (0xa88), region = 44  ;;  %s266_s23 = sand.u32 (!%p2707_p3), 1, %s2550_s24  }
  0x45   : > { %s2134_s15 = sshll.u32 (!%p2707_p3), %s266_s23, 8  ;;  %s267_s26 = scalar_lea.sflag (!%p2707_p3), [#allocation6], %s266_s23 }
  0x46   : > { %s2747_s10 = scalar_lea.vmem (!%p2707_p3), [#allocation5], %s2134_s15  ;;  %p3382_p7 = scmp.ne.s32.totalorder (!%p2707_p3), %s3378_s7, 0 }
  0x4b   : > { %2537 = dma.done.wait (%p3382_p7), %s267_s26, 4096  }
  0x4c   : > { %2539 = vsyncadd (%p3382_p7), %s267_s26, 4294963200  ;;  %s276_s8 = scalar_lea.sflag [#allocation8], %s266_s23  ;;  %s2753_s16 = scalar_lea.vmem [#allocation7], %s2134_s15 }
  0x4d   : > { %2541 = dma.done.wait (%p3382_p7), %s276_s8, 4096  }
  0x4e   : > { %2543 = vsyncadd (%p3382_p7), %s276_s8, 4294963200  ;;  %p312_p8 = scmp.lt.s32.totalorder %s2624_s5, 3  ;;  %p2137_p11 = scmp.ne.s32.totalorder %s2624_s5, 0 }
  0x4f   : > { %v323_v1 = vld [vmem:[%s3370_s0 + $0x10] sm:$0xff] (!%p2137_p11)  ;;  %v321_v2 = vld [vmem:[%s3370_s0] sm:$0xff] (!%p2137_p11)  ;;  %v2564_v3 = vmov (!%p2137_p11), 0   ;;  %v324_v4 = vld [vmem:[%s3370_s0 + $0x18] sm:$0xff] (!%p2137_p11)  ;;  %v375_v10 = vlaneseq (!%p2137_p11) }
  0x50   : > { %s313_s14 = scalar_select %p312_p8, %s2624_s5, 3 }
  0x51   : > { %320 = sbr.rel (%p2137_p11) target bundleno = 232 (0xe8), region = 56  ;;  %2260 = vset.pattern.permute.xlu1 (!%p2137_p11), %v2564_v3  ;;  %2259 = vset.pattern.permute.xlu0 (!%p2137_p11), %v2564_v3  ;;  %v322_v5 = vld [vmem:[%s3370_s0 + $0x8] sm:$0xff] (!%p2137_p11)  ;;  %v325_v7 = vld [vmem:[%s3370_s0 + $0x20] sm:$0xff] (!%p2137_p11)  ;;  %v328_v8 = vld [vmem:[%s3370_s0 + $0x38] sm:$0xff] (!%p2137_p11)  ;;  %v376_v12 = vshrl.u32 (!%p2137_p11), %v375_v10, 7 }
  0x52   : > { %s2136_s18 = sshll.u32 %s313_s14, 2  ;;  %347 = vperm.xlu1 (!%p2137_p11), %2260, %v323_v1   ;;  %337 = vperm.xlu0 (!%p2137_p11), %2259, %v321_v2   ;;  %v326_v6 = vld [vmem:[%s3370_s0 + $0x28] sm:$0xff] (!%p2137_p11)  ;;  %v327_v9 = vld [vmem:[%s3370_s0 + $0x30] sm:$0xff] (!%p2137_p11)  ;;  %v329_v11 = vld [vmem:[%s2747_s10] sm:$0x11] (!%p2137_p11) }
  0x53   : > { %s2764_s28 = scalar_lea.vmem %s3373_s3, %s2136_s18  ;;  %v330_v13 = vld [vmem:[%s2747_s10 + $0x8] sm:$0x11] (!%p2137_p11)  ;;  %v331_v14 = vunpack.c.l.bf16 (!%p2137_p11), %v329_v11  ;;  %v332_v15 = vunpack.c.h.bf16 (!%p2137_p11), %v329_v11  ;;  %v377_v18 = vsub.s32 (!%p2137_p11), 0, %v376_v12  ;;  %v431_v19 = vsub.s32 (!%p2137_p11), 1, %v376_v12 }
  0x54   : > { %v333_v16 = vunpack.c.l.bf16 (!%p2137_p11), %v330_v13  ;;  %v334_v17 = vunpack.c.h.bf16 (!%p2137_p11), %v330_v13  ;;  %v435_v20 = vsub.s32 (!%p2137_p11), 2, %v376_v12  ;;  %v439_v21 = vsub.s32 (!%p2137_p11), 3, %v376_v12  ;;  %v423_v22 = vld [vmem:[%s2764_s28] sm:$0xf] (!%p2137_p11) }
  0x55   : > { %v2794_v23 = vrot.slane (!%p2137_p11), %v331_v14, %v377_v18  ;;  %v2796_v24 = vrot.slane (!%p2137_p11), %v332_v15, %v377_v18  ;;  %v2802_v27 = vrot.slane (!%p2137_p11), %v423_v22, %v377_v18  ;;  %v2804_v28 = vrot.slane (!%p2137_p11), %v423_v22, %v431_v19 }
  0x56   : > { %352 = vperm.xlu1 (!%p2137_p11), %2260, %v324_v4   ;;  %342 = vperm.xlu0 (!%p2137_p11), %2259, %v322_v5   ;;  %v2798_v25 = vrot.slane (!%p2137_p11), %v333_v16, %v377_v18  ;;  %v2800_v26 = vrot.slane (!%p2137_p11), %v334_v17, %v377_v18  ;;  %v2806_v29 = vrot.slane (!%p2137_p11), %v423_v22, %v435_v20 }
  0x57   : > { %v2808_v30 = vrot.slane (!%p2137_p11), %v423_v22, %v439_v21 }
  0x5a   : > { %362 = vperm.xlu1 %2260, %v326_v6   ;;  %357 = vperm.xlu0 %2259, %v325_v7  }
  0x5e   : > { %372 = vperm.xlu1 %2260, %v328_v8   ;;  %367 = vperm.xlu0 %2259, %v327_v9  }
  0xd1   : > { %v348_v31 = vpop.permute.xlu1 %347  ;;  %v338_v32 = vpop.permute.xlu0 %337 }
  0xd2   : > { %v399_v33 = vmul.f32 %v2794_v23, %v348_v31  ;;  %v400_v34 = vmul.f32 %v2796_v24, %v348_v31  ;;  %v401_v35 = vmul.f32 %v2798_v25, %v348_v31  ;;  %v402_v36 = vmul.f32 %v2800_v26, %v348_v31 }
  0xd3   : > { %v391_v37 = vmul.f32 %v2794_v23, %v338_v32  ;;  %v392_v38 = vmul.f32 %v2796_v24, %v338_v32  ;;  %v393_v39 = vmul.f32 %v2798_v25, %v338_v32  ;;  %v394_v40 = vmul.f32 %v2800_v26, %v338_v32 }
  0xd4   : > { %v453_v41 = vadd.f32 %v2802_v27, %v399_v33  ;;  %v454_v42 = vadd.f32 %v2804_v28, %v400_v34  ;;  %v455_v43 = vadd.f32 %v2806_v29, %v401_v35  ;;  %v456_v44 = vadd.f32 %v2808_v30, %v402_v36 }
  0xd5   : > { %v445_v45 = vadd.f32 %v2802_v27, %v391_v37  ;;  %v446_v46 = vadd.f32 %v2804_v28, %v392_v38  ;;  %v447_v47 = vadd.f32 %v2806_v29, %v393_v39  ;;  %v448_v48 = vadd.f32 %v2808_v30, %v394_v40  ;;  %v353_v49 = vpop.permute.xlu1 %352  ;;  %v343_v50 = vpop.permute.xlu0 %342 }
  0xd6   : > { %485 = vst [vmem:[#allocation3 + $0x40] sm:$0xff] %v453_v41  ;;  %486 = vst [vmem:[#allocation3 + $0x48] sm:$0xff] %v454_v42  ;;  %v403_v51 = vmul.f32 %v2794_v23, %v353_v49  ;;  %v404_v52 = vmul.f32 %v2796_v24, %v353_v49  ;;  %v405_v53 = vmul.f32 %v2798_v25, %v353_v49 }
  0xd7   : > { %487 = vst [vmem:[#allocation3 + $0x50] sm:$0xff] %v455_v43  ;;  %488 = vst [vmem:[#allocation3 + $0x58] sm:$0xff] %v456_v44  ;;  %v406_v54 = vmul.f32 %v2800_v26, %v353_v49  ;;  %v395_v55 = vmul.f32 %v2794_v23, %v343_v50  ;;  %v396_v56 = vmul.f32 %v2796_v24, %v343_v50 }
  0xd8   : > { %477 = vst [vmem:[#allocation3] sm:$0xff] %v445_v45  ;;  %478 = vst [vmem:[#allocation3 + $0x8] sm:$0xff] %v446_v46  ;;  %v397_v57 = vmul.f32 %v2798_v25, %v343_v50  ;;  %v398_v58 = vmul.f32 %v2800_v26, %v343_v50  ;;  %v457_v59 = vadd.f32 %v2802_v27, %v403_v51 }
  0xd9   : > { %479 = vst [vmem:[#allocation3 + $0x10] sm:$0xff] %v447_v47  ;;  %480 = vst [vmem:[#allocation3 + $0x18] sm:$0xff] %v448_v48  ;;  %v458_v60 = vadd.f32 %v2804_v28, %v404_v52  ;;  %v459_v61 = vadd.f32 %v2806_v29, %v405_v53  ;;  %v460_v62 = vadd.f32 %v2808_v30, %v406_v54  ;;  %v363_v3 = vpop.permute.xlu1 %362  ;;  %v358_v4 = vpop.permute.xlu0 %357 }
  0xda   : > { %v449_v63 = vadd.f32 %v2802_v27, %v395_v55  ;;  %v450_v0 = vadd.f32 %v2804_v28, %v396_v56  ;;  %v451_v1 = vadd.f32 %v2806_v29, %v397_v57  ;;  %v452_v2 = vadd.f32 %v2808_v30, %v398_v58  ;;  %489 = vst [vmem:[#allocation3 + $0x60] sm:$0xff] %v457_v59 }
  0xdb   : > { %490 = vst [vmem:[#allocation3 + $0x68] sm:$0xff] %v458_v60  ;;  %491 = vst [vmem:[#allocation3 + $0x70] sm:$0xff] %v459_v61  ;;  %v411_v5 = vmul.f32 %v2794_v23, %v363_v3  ;;  %v412_v6 = vmul.f32 %v2796_v24, %v363_v3  ;;  %v413_v7 = vmul.f32 %v2798_v25, %v363_v3 }
  0xdc   : > { %492 = vst [vmem:[#allocation3 + $0x78] sm:$0xff] %v460_v62  ;;  %v414_v8 = vmul.f32 %v2800_v26, %v363_v3  ;;  %481 = vst [vmem:[#allocation3 + $0x20] sm:$0xff] %v449_v63  ;;  %v407_v9 = vmul.f32 %v2794_v23, %v358_v4  ;;  %v408_v10 = vmul.f32 %v2796_v24, %v358_v4 }
  0xdd   : > { %482 = vst [vmem:[#allocation3 + $0x28] sm:$0xff] %v450_v0  ;;  %483 = vst [vmem:[#allocation3 + $0x30] sm:$0xff] %v451_v1  ;;  %v409_v11 = vmul.f32 %v2798_v25, %v358_v4  ;;  %v410_v12 = vmul.f32 %v2800_v26, %v358_v4  ;;  %v465_v13 = vadd.f32 %v2802_v27, %v411_v5  ;;  %v373_v21 = vpop.permute.xlu1 %372  ;;  %v368_v22 = vpop.permute.xlu0 %367 }
  0xde   : > { %484 = vst [vmem:[#allocation3 + $0x38] sm:$0xff] %v452_v2  ;;  %v466_v14 = vadd.f32 %v2804_v28, %v412_v6  ;;  %v467_v15 = vadd.f32 %v2806_v29, %v413_v7  ;;  %v468_v16 = vadd.f32 %v2808_v30, %v414_v8  ;;  %v461_v17 = vadd.f32 %v2802_v27, %v407_v9 }
  0xdf   : > { %v462_v18 = vadd.f32 %v2804_v28, %v408_v10  ;;  %v463_v19 = vadd.f32 %v2806_v29, %v409_v11  ;;  %v464_v20 = vadd.f32 %v2808_v30, %v410_v12  ;;  %497 = vst [vmem:[#allocation3 + $0xa0] sm:$0xff] %v465_v13  ;;  %v419_v31 = vmul.f32 %v2794_v23, %v373_v21 }
  0xe0   : > { %498 = vst [vmem:[#allocation3 + $0xa8] sm:$0xff] %v466_v14  ;;  %499 = vst [vmem:[#allocation3 + $0xb0] sm:$0xff] %v467_v15  ;;  %v420_v32 = vmul.f32 %v2796_v24, %v373_v21  ;;  %v421_v33 = vmul.f32 %v2798_v25, %v373_v21  ;;  %v422_v34 = vmul.f32 %v2800_v26, %v373_v21 }
  0xe1   : > { %500 = vst [vmem:[#allocation3 + $0xb8] sm:$0xff] %v468_v16  ;;  %493 = vst [vmem:[#allocation3 + $0x80] sm:$0xff] %v461_v17  ;;  %v415_v35 = vmul.f32 %v2794_v23, %v368_v22  ;;  %v416_v36 = vmul.f32 %v2796_v24, %v368_v22  ;;  %v417_v37 = vmul.f32 %v2798_v25, %v368_v22 }
  0xe2   : > { %494 = vst [vmem:[#allocation3 + $0x88] sm:$0xff] %v462_v18  ;;  %495 = vst [vmem:[#allocation3 + $0x90] sm:$0xff] %v463_v19  ;;  %v418_v38 = vmul.f32 %v2800_v26, %v368_v22  ;;  %v473_v39 = vadd.f32 %v2802_v27, %v419_v31  ;;  %v474_v40 = vadd.f32 %v2804_v28, %v420_v32 }
  0xe3   : > { %496 = vst [vmem:[#allocation3 + $0x98] sm:$0xff] %v464_v20  ;;  %v475_v41 = vadd.f32 %v2806_v29, %v421_v33  ;;  %v476_v42 = vadd.f32 %v2808_v30, %v422_v34  ;;  %v469_v43 = vadd.f32 %v2802_v27, %v415_v35  ;;  %v470_v44 = vadd.f32 %v2804_v28, %v416_v36 }
  0xe4   : > { %v471_v23 = vadd.f32 %v2806_v29, %v417_v37  ;;  %v472_v24 = vadd.f32 %v2808_v30, %v418_v38  ;;  %505 = vst [vmem:[#allocation3 + $0xe0] sm:$0xff] %v473_v39  ;;  %506 = vst [vmem:[#allocation3 + $0xe8] sm:$0xff] %v474_v40 }
  0xe5   : > { %507 = vst [vmem:[#allocation3 + $0xf0] sm:$0xff] %v475_v41  ;;  %508 = vst [vmem:[#allocation3 + $0xf8] sm:$0xff] %v476_v42 }
  0xe6   : > { %501 = vst [vmem:[#allocation3 + $0xc0] sm:$0xff] %v469_v43  ;;  %502 = vst [vmem:[#allocation3 + $0xc8] sm:$0xff] %v470_v44 }
  0xe7   : > { %503 = vst [vmem:[#allocation3 + $0xd0] sm:$0xff] %v471_v23  ;;  %504 = vst [vmem:[#allocation3 + $0xd8] sm:$0xff] %v472_v24 }
  0xe8 PF: > { %p2138_p3 = scmp.le.s32.totalorder %s2624_s5, 0 }
  0xe9   : > { %v2261_v25 = vld [vmem:[%s2747_s10 + $0x4] ss:$16 sps:$4 sm:$0xff] (!%p2138_p3)   ;;  %v2263_v26 = vld [vmem:[%s2747_s10 + $0xc] ss:$16 sps:$4 sm:$0xff] (!%p2138_p3)   ;;  %v2565_v27 = vmov (!%p2138_p3), 0   ;;  %v559_v20 = vlaneseq (!%p2138_p3) }
  0xea   : > { %512 = sbr.rel (%p2138_p3) target bundleno = 509 (0x1fd), region = 60  ;;  %771 = vmatprep.mubr.bf16.mxu0 (!%p2138_p3), %v2565_v27  ;;  %844 = vmatprep.mubr.bf16.mxu1 (!%p2138_p3), %v2565_v27  ;;  %v2265_v28 = vld [vmem:[%s2747_s10] ss:$16 sps:$4 sm:$0xff] (!%p2138_p3)   ;;  %v2266_v29 = vld [vmem:[%s2747_s10 + $0x8] ss:$16 sps:$4 sm:$0xff] (!%p2138_p3)  }
  0xeb   : > { %739 = vmatprep.subr.bf16.mxu0 (!%p2138_p3), %v2261_v25  ;;  %812 = vmatprep.subr.bf16.mxu1 (!%p2138_p3), %v2263_v26  ;;  %v2267_v30 = vld [vmem:[%s2747_s10 + $0x24] ss:$16 sps:$4 sm:$0xff] (!%p2138_p3)   ;;  %v2269_v45 = vld [vmem:[%s2747_s10 + $0x2c] ss:$16 sps:$4 sm:$0xff] (!%p2138_p3)   ;;  %v2271_v46 = vld [vmem:[%s2747_s10 + $0x20] ss:$16 sps:$4 sm:$0xff] (!%p2138_p3)  }
  0xec   : > { %740 = vmatpush1.bf16.msra.mxu0 (!%p2138_p3), %v2265_v28  ;;  %813 = vmatpush1.bf16.msra.mxu1 (!%p2138_p3), %v2266_v29  ;;  %v2272_v47 = vld [vmem:[%s2747_s10 + $0x28] ss:$16 sps:$4 sm:$0xff] (!%p2138_p3)   ;;  %v2273_v48 = vld [vmem:[%s2747_s10 + $0x44] ss:$16 sps:$4 sm:$0xff] (!%p2138_p3)   ;;  %v2275_v49 = vld [vmem:[%s2747_s10 + $0x4c] ss:$16 sps:$4 sm:$0xff] (!%p2138_p3)  }
  0xed   : > { %741 = vmatprep.subr.bf16.mxu0 (!%p2138_p3), %v2267_v30  ;;  %814 = vmatprep.subr.bf16.mxu1 (!%p2138_p3), %v2269_v45  ;;  %v2277_v50 = vld [vmem:[%s2747_s10 + $0x40] ss:$16 sps:$4 sm:$0xff] (!%p2138_p3)   ;;  %v2278_v51 = vld [vmem:[%s2747_s10 + $0x48] ss:$16 sps:$4 sm:$0xff] (!%p2138_p3)   ;;  %v2279_v52 = vld [vmem:[%s2747_s10 + $0x64] ss:$16 sps:$4 sm:$0xff] (!%p2138_p3)  }
  0xee   : > { %v2281_v53 = vld [vmem:[%s2747_s10 + $0x6c] ss:$16 sps:$4 sm:$0xff] (!%p2138_p3)   ;;  %v2283_v54 = vld [vmem:[%s2747_s10 + $0x60] ss:$16 sps:$4 sm:$0xff] (!%p2138_p3)   ;;  %v2284_v55 = vld [vmem:[%s2747_s10 + $0x68] ss:$16 sps:$4 sm:$0xff] (!%p2138_p3)  }
  0xef   : > { %v2285_v56 = vld [vmem:[%s2747_s10 + $0x84] ss:$16 sps:$4 sm:$0xff] (!%p2138_p3)   ;;  %v2287_v57 = vld [vmem:[%s2747_s10 + $0x8c] ss:$16 sps:$4 sm:$0xff] (!%p2138_p3)   ;;  %v2289_v58 = vld [vmem:[%s2747_s10 + $0x80] ss:$16 sps:$4 sm:$0xff] (!%p2138_p3)  }
  0xf0   : > { %742 = vmatpush1.bf16.msra.mxu0 (!%p2138_p3), %v2271_v46  ;;  %815 = vmatpush1.bf16.msra.mxu1 (!%p2138_p3), %v2272_v47  ;;  %v2290_v59 = vld [vmem:[%s2747_s10 + $0x88] ss:$16 sps:$4 sm:$0xff] (!%p2138_p3)   ;;  %v2291_v60 = vld [vmem:[%s2747_s10 + $0xa4] ss:$16 sps:$4 sm:$0xff] (!%p2138_p3)   ;;  %v2293_v61 = vld [vmem:[%s2747_s10 + $0xac] ss:$16 sps:$4 sm:$0xff] (!%p2138_p3)  }
  0xf1   : > { %743 = vmatprep.subr.bf16.mxu0 %v2273_v48  ;;  %816 = vmatprep.subr.bf16.mxu1 %v2275_v49  ;;  %v2295_v62 = vld [vmem:[%s2747_s10 + $0xa0] ss:$16 sps:$4 sm:$0xff]   ;;  %v2296_v63 = vld [vmem:[%s2747_s10 + $0xa8] ss:$16 sps:$4 sm:$0xff]   ;;  %v2297_v0 = vld [vmem:[%s2747_s10 + $0xc4] ss:$16 sps:$4 sm:$0xff]  }
  0xf2   : > { %v2299_v1 = vld [vmem:[%s2747_s10 + $0xcc] ss:$16 sps:$4 sm:$0xff]   ;;  %v2301_v2 = vld [vmem:[%s2747_s10 + $0xc0] ss:$16 sps:$4 sm:$0xff]   ;;  %v2302_v3 = vld [vmem:[%s2747_s10 + $0xc8] ss:$16 sps:$4 sm:$0xff]  }
  0xf3   : > { %v2303_v4 = vld [vmem:[%s2747_s10 + $0xe4] ss:$16 sps:$4 sm:$0xff]   ;;  %v2305_v5 = vld [vmem:[%s2747_s10 + $0xec] ss:$16 sps:$4 sm:$0xff]   ;;  %v2307_v6 = vld [vmem:[%s2747_s10 + $0xe0] ss:$16 sps:$4 sm:$0xff]  }
  0xf4   : > { %744 = vmatpush1.bf16.msra.mxu0 %v2277_v50  ;;  %817 = vmatpush1.bf16.msra.mxu1 %v2278_v51  ;;  %v2308_v7 = vld [vmem:[%s2747_s10 + $0xe8] ss:$16 sps:$4 sm:$0xff]   ;;  %v513_v8 = vld [vmem:[#allocation2] sm:$0xff]  ;;  %v515_v11 = vld [vmem:[#allocation2 + $0x10] sm:$0xff]  ;;  %v560_v21 = vshrl.u32 %v559_v20, 7 }
  0xf5   : > { %745 = vmatprep.subr.bf16.mxu0 %v2279_v52  ;;  %818 = vmatprep.subr.bf16.mxu1 %v2281_v53  ;;  %v514_v9 = vld [vmem:[#allocation2 + $0x8] sm:$0xff]  ;;  %v516_v12 = vld [vmem:[#allocation2 + $0x18] sm:$0xff]  ;;  %v517_v14 = vld [vmem:[#allocation2 + $0x20] sm:$0xff] }
  0xf6   : > { %v521_v10 = vpack.c.bf16 %v514_v9, %v513_v8  ;;  %v522_v13 = vpack.c.bf16 %v516_v12, %v515_v11  ;;  %v518_v15 = vld [vmem:[#allocation2 + $0x28] sm:$0xff]  ;;  %v519_v17 = vld [vmem:[#allocation2 + $0x30] sm:$0xff]  ;;  %v520_v18 = vld [vmem:[#allocation2 + $0x38] sm:$0xff]  ;;  %v561_v22 = vsub.s32 0, %v560_v21  ;;  %v569_v31 = vsub.s32 2, %v560_v21 }
  0xf7   : > { %v523_v16 = vpack.c.bf16 %v518_v15, %v517_v14  ;;  %v524_v19 = vpack.c.bf16 %v520_v18, %v519_v17  ;;  %v557_v32 = vld [vmem:[%s2764_s28] sm:$0xf]  ;;  %v565_v33 = vsub.s32 1, %v560_v21  ;;  %v573_v34 = vsub.s32 3, %v560_v21 }
  0xf8   : > { %746 = vmatpush1.bf16.msra.mxu0 %v2283_v54  ;;  %819 = vmatpush1.bf16.msra.mxu1 %v2284_v55  ;;  %v2916_v35 = vrot.slane %v557_v32, %v561_v22  ;;  %v2918_v36 = vrot.slane %v557_v32, %v569_v31 }
  0xf9   : > { %747 = vmatprep.subr.bf16.mxu0 %v2285_v56  ;;  %820 = vmatprep.subr.bf16.mxu1 %v2287_v57  ;;  %v2920_v37 = vrot.slane %v557_v32, %v565_v33  ;;  %v2922_v38 = vrot.slane %v557_v32, %v573_v34 }
  0xfc   : > { %748 = vmatpush1.bf16.msra.mxu0 %v2289_v58  ;;  %821 = vmatpush1.bf16.msra.mxu1 %v2290_v59 }
  0xfd   : > { %749 = vmatprep.subr.bf16.mxu0 %v2291_v60  ;;  %822 = vmatprep.subr.bf16.mxu1 %v2293_v61 }
 0x100   : > { %750 = vmatpush1.bf16.msra.mxu0 %v2295_v62  ;;  %823 = vmatpush1.bf16.msra.mxu1 %v2296_v63 }
 0x101   : > { %751 = vmatprep.subr.bf16.mxu0 %v2297_v0  ;;  %824 = vmatprep.subr.bf16.mxu1 %v2299_v1 }
 0x104   : > { %752 = vmatpush1.bf16.msra.mxu0 %v2301_v2  ;;  %825 = vmatpush1.bf16.msra.mxu1 %v2302_v3 }
 0x105   : > { %753 = vmatprep.subr.bf16.mxu0 %v2303_v4  ;;  %826 = vmatprep.subr.bf16.mxu1 %v2305_v5 }
 0x108   : > { %754 = vmatpush1.bf16.msra.mxu0 %v2307_v6  ;;  %827 = vmatpush1.bf16.msra.mxu1 %v2308_v7 }
 0x10b   : > { %772 = vmatmul.mubr.bf16.vlgmr.msra.gmra.mrb[0].mxu0 %v521_v10  ;;  %845 = vmatmul.mubr.bf16.vlgmr.msra.gmra.mrb[0].mxu1 %v521_v10 }
 0x10c   : > { %781 = vmatprep.mubr.bf16.mxu0 %v2565_v27  ;;  %854 = vmatprep.mubr.bf16.mxu1 %v2565_v27 }
 0x113   : > { %782 = vmatmul.mubr.bf16.gmra.mrb[4].mxu0 %v522_v13  ;;  %855 = vmatmul.mubr.bf16.gmra.mrb[4].mxu1 %v522_v13 }
 0x114   : > { %791 = vmatprep.mubr.bf16.mxu0 %v2565_v27  ;;  %864 = vmatprep.mubr.bf16.mxu1 %v2565_v27 }
 0x11b   : > { %792 = vmatmul.mubr.bf16.gmra.mrb[8].mxu0 %v523_v16  ;;  %865 = vmatmul.mubr.bf16.gmra.mrb[8].mxu1 %v523_v16 }
 0x11c   : > { %801 = vmatprep.mubr.bf16.mxu0 %v2565_v27  ;;  %874 = vmatprep.mubr.bf16.mxu1 %v2565_v27 }
 0x123   : > { %802 = vmatmul.mubr.bf16.gmra.mrb[12].mxu0 %v524_v19  ;;  %875 = vmatmul.mubr.bf16.gmra.mrb[12].mxu1 %v524_v19 }
 0x1de   : > { %v773_v39 = vpop.f32.mrb[0].mxu0  ;;  %v846_v40 = vpop.f32.mrb[0].mxu1 }
 0x1df   : > { %v774_v41 = vadd.f32 %v773_v39, %v2916_v35  ;;  %v847_v42 = vadd.f32 %v846_v40, %v2918_v36  ;;  %v775_v43 = vpop.f32.mrb[1].mxu0  ;;  %v848_v44 = vpop.f32.mrb[1].mxu1 }
 0x1e0   : > { %v776_v23 = vadd.f32 %v775_v43, %v2920_v37  ;;  %v849_v24 = vadd.f32 %v848_v44, %v2922_v38  ;;  %v777_v25 = vpop.f32.mrb[2].mxu0  ;;  %v850_v26 = vpop.f32.mrb[2].mxu1 }
 0x1e1   : > { %885 = vst [vmem:[#allocation3] sm:$0xff] %v774_v41  ;;  %887 = vst [vmem:[#allocation3 + $0x10] sm:$0xff] %v847_v42  ;;  %v778_v27 = vadd.f32 %v777_v25, %v2916_v35  ;;  %v851_v28 = vadd.f32 %v850_v26, %v2918_v36  ;;  %v779_v29 = vpop.f32.mrb[3].mxu0  ;;  %v852_v30 = vpop.f32.mrb[3].mxu1 }
 0x1e2   : > { %886 = vst [vmem:[#allocation3 + $0x8] sm:$0xff] %v776_v23  ;;  %888 = vst [vmem:[#allocation3 + $0x18] sm:$0xff] %v849_v24  ;;  %v780_v45 = vadd.f32 %v779_v29, %v2920_v37  ;;  %v853_v46 = vadd.f32 %v852_v30, %v2922_v38 }
 0x1e3   : > { %889 = vst [vmem:[#allocation3 + $0x20] sm:$0xff] %v778_v27  ;;  %891 = vst [vmem:[#allocation3 + $0x30] sm:$0xff] %v851_v28 }
 0x1e4   : > { %890 = vst [vmem:[#allocation3 + $0x28] sm:$0xff] %v780_v45  ;;  %892 = vst [vmem:[#allocation3 + $0x38] sm:$0xff] %v853_v46 }
 0x1e6   : > { %v783_v47 = vpop.f32.mrb[4].mxu0  ;;  %v856_v48 = vpop.f32.mrb[4].mxu1 }
 0x1e7   : > { %v784_v49 = vadd.f32 %v783_v47, %v2916_v35  ;;  %v857_v50 = vadd.f32 %v856_v48, %v2918_v36  ;;  %v785_v51 = vpop.f32.mrb[5].mxu0  ;;  %v858_v52 = vpop.f32.mrb[5].mxu1 }
 0x1e8   : > { %v786_v53 = vadd.f32 %v785_v51, %v2920_v37  ;;  %v859_v54 = vadd.f32 %v858_v52, %v2922_v38  ;;  %v787_v55 = vpop.f32.mrb[6].mxu0  ;;  %v860_v56 = vpop.f32.mrb[6].mxu1 }
 0x1e9   : > { %893 = vst [vmem:[#allocation3 + $0x40] sm:$0xff] %v784_v49  ;;  %895 = vst [vmem:[#allocation3 + $0x50] sm:$0xff] %v857_v50  ;;  %v788_v57 = vadd.f32 %v787_v55, %v2916_v35  ;;  %v861_v58 = vadd.f32 %v860_v56, %v2918_v36  ;;  %v789_v59 = vpop.f32.mrb[7].mxu0  ;;  %v862_v60 = vpop.f32.mrb[7].mxu1 }
 0x1ea   : > { %894 = vst [vmem:[#allocation3 + $0x48] sm:$0xff] %v786_v53  ;;  %896 = vst [vmem:[#allocation3 + $0x58] sm:$0xff] %v859_v54  ;;  %v790_v61 = vadd.f32 %v789_v59, %v2920_v37  ;;  %v863_v62 = vadd.f32 %v862_v60, %v2922_v38 }
 0x1eb   : > { %897 = vst [vmem:[#allocation3 + $0x60] sm:$0xff] %v788_v57  ;;  %899 = vst [vmem:[#allocation3 + $0x70] sm:$0xff] %v861_v58 }
 0x1ec   : > { %898 = vst [vmem:[#allocation3 + $0x68] sm:$0xff] %v790_v61  ;;  %900 = vst [vmem:[#allocation3 + $0x78] sm:$0xff] %v863_v62 }
 0x1ee   : > { %v793_v63 = vpop.f32.mrb[8].mxu0  ;;  %v866_v0 = vpop.f32.mrb[8].mxu1 }
 0x1ef   : > { %v794_v1 = vadd.f32 %v793_v63, %v2916_v35  ;;  %v867_v2 = vadd.f32 %v866_v0, %v2918_v36  ;;  %v795_v3 = vpop.f32.mrb[9].mxu0  ;;  %v868_v4 = vpop.f32.mrb[9].mxu1 }
 0x1f0   : > { %v796_v5 = vadd.f32 %v795_v3, %v2920_v37  ;;  %v869_v6 = vadd.f32 %v868_v4, %v2922_v38  ;;  %v797_v7 = vpop.f32.mrb[10].mxu0  ;;  %v870_v8 = vpop.f32.mrb[10].mxu1 }
 0x1f1   : > { %901 = vst [vmem:[#allocation3 + $0x80] sm:$0xff] %v794_v1  ;;  %903 = vst [vmem:[#allocation3 + $0x90] sm:$0xff] %v867_v2  ;;  %v798_v9 = vadd.f32 %v797_v7, %v2916_v35  ;;  %v871_v10 = vadd.f32 %v870_v8, %v2918_v36  ;;  %v799_v11 = vpop.f32.mrb[11].mxu0  ;;  %v872_v12 = vpop.f32.mrb[11].mxu1 }
 0x1f2   : > { %902 = vst [vmem:[#allocation3 + $0x88] sm:$0xff] %v796_v5  ;;  %904 = vst [vmem:[#allocation3 + $0x98] sm:$0xff] %v869_v6  ;;  %v800_v13 = vadd.f32 %v799_v11, %v2920_v37  ;;  %v873_v14 = vadd.f32 %v872_v12, %v2922_v38 }
 0x1f3   : > { %905 = vst [vmem:[#allocation3 + $0xa0] sm:$0xff] %v798_v9  ;;  %907 = vst [vmem:[#allocation3 + $0xb0] sm:$0xff] %v871_v10 }
 0x1f4   : > { %906 = vst [vmem:[#allocation3 + $0xa8] sm:$0xff] %v800_v13  ;;  %908 = vst [vmem:[#allocation3 + $0xb8] sm:$0xff] %v873_v14 }
 0x1f6   : > { %v803_v15 = vpop.f32.mrb[12].mxu0  ;;  %v876_v16 = vpop.f32.mrb[12].mxu1 }
 0x1f7   : > { %v804_v17 = vadd.f32 %v803_v15, %v2916_v35  ;;  %v877_v18 = vadd.f32 %v876_v16, %v2918_v36  ;;  %v805_v19 = vpop.f32.mrb[13].mxu0  ;;  %v878_v20 = vpop.f32.mrb[13].mxu1 }
 0x1f8   : > { %v806_v21 = vadd.f32 %v805_v19, %v2920_v37  ;;  %v879_v22 = vadd.f32 %v878_v20, %v2922_v38  ;;  %v807_v31 = vpop.f32.mrb[14].mxu0  ;;  %v880_v32 = vpop.f32.mrb[14].mxu1 }
 0x1f9   : > { %909 = vst [vmem:[#allocation3 + $0xc0] sm:$0xff] %v804_v17  ;;  %911 = vst [vmem:[#allocation3 + $0xd0] sm:$0xff] %v877_v18  ;;  %v808_v33 = vadd.f32 %v807_v31, %v2916_v35  ;;  %v881_v34 = vadd.f32 %v880_v32, %v2918_v36  ;;  %v809_v39 = vpop.f32.mrb[15].mxu0  ;;  %v882_v40 = vpop.f32.mrb[15].mxu1 }
 0x1fa   : > { %910 = vst [vmem:[#allocation3 + $0xc8] sm:$0xff] %v806_v21  ;;  %912 = vst [vmem:[#allocation3 + $0xd8] sm:$0xff] %v879_v22  ;;  %v810_v41 = vadd.f32 %v809_v39, %v2920_v37  ;;  %v883_v42 = vadd.f32 %v882_v40, %v2922_v38 }
 0x1fb   : > { %913 = vst [vmem:[#allocation3 + $0xe0] sm:$0xff] %v808_v33  ;;  %915 = vst [vmem:[#allocation3 + $0xf0] sm:$0xff] %v881_v34 }
 0x1fc   : > { %914 = vst [vmem:[#allocation3 + $0xe8] sm:$0xff] %v810_v41  ;;  %916 = vst [vmem:[#allocation3 + $0xf8] sm:$0xff] %v883_v42 }
 0x1fd PF: > { %v2957_v35 = vld [vmem:[%s2753_s16 + $0x4] ss:$16 sps:$4 sm:$0xff]   ;;  %v2960_v36 = vld [vmem:[%s2753_s16] ss:$16 sps:$4 sm:$0xff]   ;;  %v2566_v37 = vmov 0   ;;  %p2203_p6 = scmp.ne.s32.totalorder %s2624_s5, 3 }
 0x1fe   : > { %1148 = vmatprep.mubr.bf16.mxu0 %v2566_v37  ;;  %1189 = vmatprep.mubr.bf16.mxu1 %v2566_v37  ;;  %v2966_v38 = vld [vmem:[%s2753_s16 + $0xc] ss:$16 sps:$4 sm:$0xff]   ;;  %v2970_v43 = vld [vmem:[%s2753_s16 + $0x24] ss:$16 sps:$4 sm:$0xff]   ;;  %v2973_v44 = vld [vmem:[%s2753_s16 + $0x8] ss:$16 sps:$4 sm:$0xff]  }
 0x1ff   : > { %1116 = vmatprep.subr.bf16.mxu0 %v2957_v35  ;;  %v2976_v23 = vld [vmem:[%s2753_s16 + $0x20] ss:$16 sps:$4 sm:$0xff]   ;;  %1157 = vmatprep.subr.bf16.mxu1 %v2966_v38  ;;  %v2980_v24 = vld [vmem:[%s2753_s16 + $0x2c] ss:$16 sps:$4 sm:$0xff]   ;;  %v2985_v25 = vld [vmem:[%s2753_s16 + $0x44] ss:$16 sps:$4 sm:$0xff]  }
 0x200   : > { %1117 = vmatpush1.bf16.msra.mxu0 %v2960_v36  ;;  %1158 = vmatpush1.bf16.msra.mxu1 %v2973_v44  ;;  %v2989_v26 = vld [vmem:[%s2753_s16 + $0x28] ss:$16 sps:$4 sm:$0xff]   ;;  %v2992_v27 = vld [vmem:[%s2753_s16 + $0x40] ss:$16 sps:$4 sm:$0xff]   ;;  %v2996_v28 = vld [vmem:[%s2753_s16 + $0x4c] ss:$16 sps:$4 sm:$0xff]  }
 0x201   : > { %1118 = vmatprep.subr.bf16.mxu0 %v2970_v43  ;;  %1159 = vmatprep.subr.bf16.mxu1 %v2980_v24  ;;  %v3000_v29 = vld [vmem:[%s2753_s16 + $0x64] ss:$16 sps:$4 sm:$0xff]   ;;  %v3004_v30 = vld [vmem:[%s2753_s16 + $0x48] ss:$16 sps:$4 sm:$0xff]   ;;  %v3008_v45 = vld [vmem:[%s2753_s16 + $0x6c] ss:$16 sps:$4 sm:$0xff]  }
 0x202   : > { %v3012_v46 = vld [vmem:[%s2753_s16 + $0x60] ss:$16 sps:$4 sm:$0xff]   ;;  %v3016_v47 = vld [vmem:[%s2753_s16 + $0x84] ss:$16 sps:$4 sm:$0xff]   ;;  %v3020_v48 = vld [vmem:[%s2753_s16 + $0x68] ss:$16 sps:$4 sm:$0xff]  }
 0x203   : > { %v3024_v49 = vld [vmem:[%s2753_s16 + $0x8c] ss:$16 sps:$4 sm:$0xff]   ;;  %v3028_v50 = vld [vmem:[%s2753_s16 + $0x80] ss:$16 sps:$4 sm:$0xff]   ;;  %v3032_v51 = vld [vmem:[%s2753_s16 + $0xa4] ss:$16 sps:$4 sm:$0xff]  }
 0x204   : > { %1119 = vmatpush1.bf16.msra.mxu0 %v2976_v23  ;;  %1160 = vmatpush1.bf16.msra.mxu1 %v2989_v26  ;;  %v3036_v52 = vld [vmem:[%s2753_s16 + $0x88] ss:$16 sps:$4 sm:$0xff]   ;;  %v3040_v53 = vld [vmem:[%s2753_s16 + $0xac] ss:$16 sps:$4 sm:$0xff]   ;;  %v3044_v54 = vld [vmem:[%s2753_s16 + $0xa0] ss:$16 sps:$4 sm:$0xff]  }
 0x205   : > { %1120 = vmatprep.subr.bf16.mxu0 %v2985_v25  ;;  %1161 = vmatprep.subr.bf16.mxu1 %v2996_v28  ;;  %v3048_v55 = vld [vmem:[%s2753_s16 + $0xc4] ss:$16 sps:$4 sm:$0xff]   ;;  %v3052_v56 = vld [vmem:[%s2753_s16 + $0xa8] ss:$16 sps:$4 sm:$0xff]   ;;  %v3056_v57 = vld [vmem:[%s2753_s16 + $0xcc] ss:$16 sps:$4 sm:$0xff]  }
 0x206   : > { %v3060_v58 = vld [vmem:[%s2753_s16 + $0xc0] ss:$16 sps:$4 sm:$0xff]   ;;  %v3064_v59 = vld [vmem:[%s2753_s16 + $0xe4] ss:$16 sps:$4 sm:$0xff]   ;;  %v3068_v60 = vld [vmem:[%s2753_s16 + $0xc8] ss:$16 sps:$4 sm:$0xff]  }
 0x207   : > { %v3072_v61 = vld [vmem:[%s2753_s16 + $0xec] ss:$16 sps:$4 sm:$0xff]   ;;  %v3076_v62 = vld [vmem:[%s2753_s16 + $0xe0] ss:$16 sps:$4 sm:$0xff]   ;;  %v3081_v63 = vld [vmem:[%s2753_s16 + $0xe8] ss:$16 sps:$4 sm:$0xff]  }
 0x208   : > { %1121 = vmatpush1.bf16.msra.mxu0 %v2992_v27  ;;  %1162 = vmatpush1.bf16.msra.mxu1 %v3004_v30  ;;  %v952_v0 = vld [vmem:[#allocation3] sm:$0xff]  ;;  %v953_v1 = vld [vmem:[#allocation3 + $0x8] sm:$0xff]  ;;  %v955_v5 = vld [vmem:[#allocation3 + $0x18] sm:$0xff]  ;;  %vm2041_vm0 = vcmask (!%p2203_p6), 7168  }
 0x209   : > { %1122 = vmatprep.subr.bf16.mxu0 %v3000_v29  ;;  %1163 = vmatprep.subr.bf16.mxu1 %v3008_v45  ;;  %v954_v16 = vld [vmem:[#allocation3 + $0x10] sm:$0xff] }
 0x20c   : > { %1123 = vmatpush1.bf16.msra.mxu0 %v3012_v46  ;;  %1164 = vmatpush1.bf16.msra.mxu1 %v3020_v48 }
 0x20d   : > { %1124 = vmatprep.subr.bf16.mxu0 %v3016_v47  ;;  %1165 = vmatprep.subr.bf16.mxu1 %v3024_v49 }
 0x210   : > { %1125 = vmatpush1.bf16.msra.mxu0 %v3028_v50  ;;  %1166 = vmatpush1.bf16.msra.mxu1 %v3036_v52 }
 0x211   : > { %1126 = vmatprep.subr.bf16.mxu0 %v3032_v51  ;;  %1167 = vmatprep.subr.bf16.mxu1 %v3040_v53 }
 0x214   : > { %1127 = vmatpush1.bf16.msra.mxu0 %v3044_v54  ;;  %1168 = vmatpush1.bf16.msra.mxu1 %v3052_v56 }
 0x215   : > { %1128 = vmatprep.subr.bf16.mxu0 %v3048_v55  ;;  %1169 = vmatprep.subr.bf16.mxu1 %v3056_v57 }
 0x218   : > { %1129 = vmatpush1.bf16.msra.mxu0 %v3060_v58  ;;  %1170 = vmatpush1.bf16.msra.mxu1 %v3068_v60 }
 0x219   : > { %1130 = vmatprep.subr.bf16.mxu0 %v3064_v59  ;;  %1171 = vmatprep.subr.bf16.mxu1 %v3072_v61 }
 0x21c   : > { %1131 = vmatpush1.bf16.msra.mxu0 %v3076_v62  ;;  %1172 = vmatpush1.bf16.msra.mxu1 %v3081_v63 }
 0x21d   : > { %1229 = vmatprep.subr.bf16.mxu0 %v2957_v35  ;;  %1270 = vmatprep.subr.bf16.mxu1 %v2966_v38 }
 0x21f   : > { %1149 = vmatmul.mubr.bf16.vlgmr.msra.gmra.mrb[0].mxu0 %v2566_v37  ;;  %1190 = vmatmul.mubr.bf16.vlgmr.msra.gmra.mrb[0].mxu1 %v2566_v37 }
 0x220   : > { %1230 = vmatpush1.bf16.msra.mxu0 %v2960_v36  ;;  %1261 = vmatprep.mubr.bf16.mxu0 %v2566_v37 }
 0x221   : > { %1231 = vmatprep.subr.bf16.mxu0 %v2970_v43  ;;  %1271 = vmatpush1.bf16.msra.mxu1 %v2973_v44 }
 0x222   : > { %1302 = vmatprep.mubr.bf16.mxu1 %v2566_v37  ;;  %1272 = vmatprep.subr.bf16.mxu1 %v2980_v24 }
 0x224   : > { %1232 = vmatpush1.bf16.msra.mxu0 %v2976_v23 }
 0x225   : > { %1233 = vmatprep.subr.bf16.mxu0 %v2985_v25  ;;  %1273 = vmatpush1.bf16.msra.mxu1 %v2989_v26 }
 0x226   : > { %1274 = vmatprep.subr.bf16.mxu1 %v2996_v28 }
 0x228   : > { %1234 = vmatpush1.bf16.msra.mxu0 %v2992_v27 }
 0x229   : > { %1235 = vmatprep.subr.bf16.mxu0 %v3000_v29  ;;  %1275 = vmatpush1.bf16.msra.mxu1 %v3004_v30 }
 0x22a   : > { %1276 = vmatprep.subr.bf16.mxu1 %v3008_v45 }
 0x22c   : > { %1236 = vmatpush1.bf16.msra.mxu0 %v3012_v46 }
 0x22d   : > { %1237 = vmatprep.subr.bf16.mxu0 %v3016_v47  ;;  %1277 = vmatpush1.bf16.msra.mxu1 %v3020_v48 }
 0x22e   : > { %1278 = vmatprep.subr.bf16.mxu1 %v3024_v49 }
 0x230   : > { %1238 = vmatpush1.bf16.msra.mxu0 %v3028_v50 }
 0x231   : > { %1239 = vmatprep.subr.bf16.mxu0 %v3032_v51  ;;  %1279 = vmatpush1.bf16.msra.mxu1 %v3036_v52 }
 0x232   : > { %1280 = vmatprep.subr.bf16.mxu1 %v3040_v53 }
 0x234   : > { %1240 = vmatpush1.bf16.msra.mxu0 %v3044_v54 }
 0x235   : > { %1241 = vmatprep.subr.bf16.mxu0 %v3048_v55  ;;  %1281 = vmatpush1.bf16.msra.mxu1 %v3052_v56 }
 0x236   : > { %1282 = vmatprep.subr.bf16.mxu1 %v3056_v57 }
 0x238   : > { %1242 = vmatpush1.bf16.msra.mxu0 %v3060_v58 }
 0x239   : > { %1243 = vmatprep.subr.bf16.mxu0 %v3064_v59  ;;  %1283 = vmatpush1.bf16.msra.mxu1 %v3068_v60 }
 0x23a   : > { %1284 = vmatprep.subr.bf16.mxu1 %v3072_v61 }
 0x23c   : > { %1244 = vmatpush1.bf16.msra.mxu0 %v3076_v62 }
 0x23d   : > { %1343 = vmatprep.subr.bf16.mxu0 %v2957_v35  ;;  %1285 = vmatpush1.bf16.msra.mxu1 %v3081_v63 }
 0x23e   : > { %1384 = vmatprep.subr.bf16.mxu1 %v2966_v38 }
 0x2f2   : > { %v1150_v2 = vpop.f32.mrb[0].mxu0  ;;  %v1191_v8 = vpop.f32.mrb[0].mxu1 }
 0x2f3   : > { %v1198_v3 = vadd.f32 %v1150_v2, %v952_v0  ;;  %v1152_v4 = vpop.f32.mrb[1].mxu0  ;;  %v1193_v11 = vpop.f32.mrb[1].mxu1  ;;  %v1200_v17 = vadd.f32 %v1191_v8, %v954_v16 }
 0x2f4   : > { %v1199_v6 = vadd.f32 %v1152_v4, %v953_v1  ;;  %v1154_v7 = vpop.f32.mrb[2].mxu0  ;;  %v1201_v13 = vadd.f32 %v1193_v11, %v955_v5  ;;  %v1195_v14 = vpop.f32.mrb[2].mxu1  ;;  %v1224_v4 = vld [vmem:[#allocation3 + $0x20] sm:$0xff]  ;;  %v1225_v5 = vld [vmem:[#allocation3 + $0x28] sm:$0xff] }
 0x2f5   : > { %v1202_v9 = vmul.f32 0.5, %v1198_v3  ;;  %v1155_v10 = vpop.f32.mrb[3].mxu0  ;;  %v1196_v15 = vpop.f32.mrb[3].mxu1  ;;  %v1204_v18 = vmul.f32 0.5, %v1200_v17 }
 0x2f6   : > { %v1203_v12 = vmul.f32 0.5, %v1199_v6 }
 0x2f7   : > { %2357 = vtanh.f32 %v1202_v9 }
 0x2f8   : > { %2359 = vtanh.f32 %v1203_v12  ;;  %v1227_v12 = vld [vmem:[#allocation3 + $0x38] sm:$0xff] }
 0x2f9   : > { %2361 = vtanh.f32 %v1201_v13 }
 0x2fa   : > { %2363 = vtanh.f32 %v1204_v18 }
 0x301   : > { %v2358_v19 = vpop.eup %2357 }
 0x302   : > { %v2360_v20 = vpop.eup %2359  ;;  %v1208_v21 = vmul.f32 0.5, %v2358_v19 }
 0x303   : > { %v1209_v22 = vmul.f32 0.5, %v2360_v20  ;;  %v2362_v31 = vpop.eup %2361  ;;  %v1226_v20 = vld [vmem:[#allocation3 + $0x30] sm:$0xff] }
 0x304   : > { %v1211_v32 = vadd.f32 0.5, %v1208_v21  ;;  %v2364_v41 = vpop.eup %2363 }
 0x305   : > { %v1212_v33 = vadd.f32 0.5, %v1209_v22  ;;  %v1210_v42 = vmul.f32 0.5, %v2364_v41 }
 0x306   : > { %v1216_v34 = vmul.f32 %v2362_v31, %v1211_v32 }
 0x307   : > { %v1215_v39 = vmul.f32 0.0, %v1212_v33  ;;  %v1213_v0 = vadd.f32 0.5, %v1210_v42 }
 0x309   : > { %v3124_v40 = vadd.f32 %v1216_v34, %v1215_v39 }
 0x30b   : > { %2365 = vtanh.f32 %v3124_v40 }
 0x315   : > { %v2366_v1 = vpop.eup %2365 }
 0x316   : > { %v1219_v2 = vmul.f32 %v2366_v1, %v1213_v0 }
 0x318   : > { %1220 = vst [vmem:[#allocation2] sm:$0xff] %v1219_v2  ;;  %v1228_v3 = vpack.c.bf16 %v1219_v2, %v1219_v2 }
 0x31a   : > { %1262 = vmatmul.mubr.bf16.vlgmr.msra.gmra.mrb[4].mxu0 %v1228_v3  ;;  %1303 = vmatmul.mubr.bf16.vlgmr.msra.gmra.mrb[4].mxu1 %v1228_v3 }
 0x31b   : > { %1344 = vmatpush1.bf16.msra.mxu0 %v2960_v36  ;;  %1385 = vmatpush1.bf16.msra.mxu1 %v2973_v44 }
 0x31c   : > { %1345 = vmatprep.subr.bf16.mxu0 %v2970_v43  ;;  %1386 = vmatprep.subr.bf16.mxu1 %v2980_v24 }
 0x31d   : > { %1375 = vmatprep.mubr.bf16.mxu0 %v2566_v37  ;;  %1416 = vmatprep.mubr.bf16.mxu1 %v2566_v37 }
 0x31f   : > { %1346 = vmatpush1.bf16.msra.mxu0 %v2976_v23  ;;  %1387 = vmatpush1.bf16.msra.mxu1 %v2989_v26 }
 0x320   : > { %1347 = vmatprep.subr.bf16.mxu0 %v2985_v25  ;;  %1388 = vmatprep.subr.bf16.mxu1 %v2996_v28 }
 0x323   : > { %1348 = vmatpush1.bf16.msra.mxu0 %v2992_v27  ;;  %1389 = vmatpush1.bf16.msra.mxu1 %v3004_v30 }
 0x324   : > { %1349 = vmatprep.subr.bf16.mxu0 %v3000_v29  ;;  %1390 = vmatprep.subr.bf16.mxu1 %v3008_v45 }
 0x327   : > { %1350 = vmatpush1.bf16.msra.mxu0 %v3012_v46  ;;  %1391 = vmatpush1.bf16.msra.mxu1 %v3020_v48 }
 0x328   : > { %1351 = vmatprep.subr.bf16.mxu0 %v3016_v47  ;;  %1392 = vmatprep.subr.bf16.mxu1 %v3024_v49 }
 0x32b   : > { %1352 = vmatpush1.bf16.msra.mxu0 %v3028_v50  ;;  %1393 = vmatpush1.bf16.msra.mxu1 %v3036_v52 }
 0x32c   : > { %1353 = vmatprep.subr.bf16.mxu0 %v3032_v51  ;;  %1394 = vmatprep.subr.bf16.mxu1 %v3040_v53 }
 0x32f   : > { %1354 = vmatpush1.bf16.msra.mxu0 %v3044_v54  ;;  %1395 = vmatpush1.bf16.msra.mxu1 %v3052_v56 }
 0x330   : > { %1355 = vmatprep.subr.bf16.mxu0 %v3048_v55  ;;  %1396 = vmatprep.subr.bf16.mxu1 %v3056_v57 }
 0x333   : > { %1356 = vmatpush1.bf16.msra.mxu0 %v3060_v58  ;;  %1397 = vmatpush1.bf16.msra.mxu1 %v3068_v60 }
 0x334   : > { %1357 = vmatprep.subr.bf16.mxu0 %v3064_v59  ;;  %1398 = vmatprep.subr.bf16.mxu1 %v3072_v61 }
 0x337   : > { %1358 = vmatpush1.bf16.msra.mxu0 %v3076_v62  ;;  %1399 = vmatpush1.bf16.msra.mxu1 %v3081_v63 }
 0x338   : > { %1457 = vmatprep.subr.bf16.mxu0 %v2957_v35  ;;  %1498 = vmatprep.subr.bf16.mxu1 %v2966_v38 }
 0x3ed   : > { %v1263_v6 = vpop.f32.mrb[4].mxu0  ;;  %v1304_v7 = vpop.f32.mrb[4].mxu1 }
 0x3ee   : > { %v1311_v8 = vadd.f32 %v1263_v6, %v1224_v4  ;;  %v1265_v9 = vpop.f32.mrb[5].mxu0  ;;  %v1306_v10 = vpop.f32.mrb[5].mxu1  ;;  %v1313_v21 = vadd.f32 %v1304_v7, %v1226_v20 }
 0x3ef   : > { %v1312_v11 = vadd.f32 %v1265_v9, %v1225_v5  ;;  %v1267_v13 = vpop.f32.mrb[6].mxu0  ;;  %v1308_v14 = vpop.f32.mrb[6].mxu1  ;;  %v1314_v19 = vadd.f32 %v1306_v10, %v1227_v12  ;;  %v1339_v9 = vld [vmem:[#allocation3 + $0x48] sm:$0xff] }
 0x3f0   : > { %v1315_v15 = vmul.f32 0.5, %v1311_v8  ;;  %v1268_v16 = vpop.f32.mrb[7].mxu0  ;;  %v1309_v17 = vpop.f32.mrb[7].mxu1  ;;  %v1317_v22 = vmul.f32 0.5, %v1313_v21 }
 0x3f1   : > { %v1316_v18 = vmul.f32 0.5, %v1312_v11  ;;  %v1341_v16 = vld [vmem:[#allocation3 + $0x58] sm:$0xff] }
 0x3f2   : > { %2367 = vtanh.f32 %v1315_v15 }
 0x3f3   : > { %2369 = vtanh.f32 %v1316_v18 }
 0x3f4   : > { %2371 = vtanh.f32 %v1314_v19 }
 0x3f5   : > { %2373 = vtanh.f32 %v1317_v22 }
 0x3fc   : > { %v2368_v31 = vpop.eup %2367 }
 0x3fd   : > { %v1321_v32 = vmul.f32 0.5, %v2368_v31  ;;  %v2370_v33 = vpop.eup %2369 }
 0x3fe   : > { %v1322_v39 = vmul.f32 0.5, %v2370_v33  ;;  %v2372_v41 = vpop.eup %2371 }
 0x3ff   : > { %v1324_v34 = vadd.f32 0.5, %v1321_v32  ;;  %v2374_v3 = vpop.eup %2373  ;;  %v1340_v32 = vld [vmem:[#allocation3 + $0x50] sm:$0xff] }
 0x400   : > { %v1325_v42 = vadd.f32 0.5, %v1322_v39  ;;  %v1323_v4 = vmul.f32 0.5, %v2374_v3 }
 0x401   : > { %v1329_v0 = vmul.f32 %v2372_v41, %v1324_v34 }
 0x402   : > { %v1328_v1 = vmul.f32 %v1325_v42, %v3124_v40  ;;  %v1326_v5 = vadd.f32 0.5, %v1323_v4  ;;  %v1338_v40 = vld [vmem:[#allocation3 + $0x40] sm:$0xff] }
 0x404   : > { %v3162_v2 = vadd.f32 %v1329_v0, %v1328_v1 }
 0x406   : > { %2375 = vtanh.f32 %v3162_v2 }
 0x410   : > { %v2376_v6 = vpop.eup %2375 }
 0x411   : > { %v1332_v7 = vmul.f32 %v2376_v6, %v1326_v5 }
 0x413   : > { %1334 = vst [vmem:[#allocation2 + $0x8] sm:$0xff] %v1332_v7  ;;  %v1342_v8 = vpack.c.bf16 %v1332_v7, %v1332_v7 }
 0x415   : > { %1376 = vmatmul.mubr.bf16.vlgmr.msra.gmra.mrb[8].mxu0 %v1342_v8  ;;  %1417 = vmatmul.mubr.bf16.vlgmr.msra.gmra.mrb[8].mxu1 %v1342_v8 }
 0x416   : > { %1458 = vmatpush1.bf16.msra.mxu0 %v2960_v36  ;;  %1499 = vmatpush1.bf16.msra.mxu1 %v2973_v44 }
 0x417   : > { %1459 = vmatprep.subr.bf16.mxu0 %v2970_v43  ;;  %1500 = vmatprep.subr.bf16.mxu1 %v2980_v24 }
 0x418   : > { %1489 = vmatprep.mubr.bf16.mxu0 %v2566_v37  ;;  %1530 = vmatprep.mubr.bf16.mxu1 %v2566_v37 }
 0x41a   : > { %1460 = vmatpush1.bf16.msra.mxu0 %v2976_v23  ;;  %1501 = vmatpush1.bf16.msra.mxu1 %v2989_v26 }
 0x41b   : > { %1461 = vmatprep.subr.bf16.mxu0 %v2985_v25  ;;  %1502 = vmatprep.subr.bf16.mxu1 %v2996_v28 }
 0x41e   : > { %1462 = vmatpush1.bf16.msra.mxu0 %v2992_v27  ;;  %1503 = vmatpush1.bf16.msra.mxu1 %v3004_v30 }
 0x41f   : > { %1463 = vmatprep.subr.bf16.mxu0 %v3000_v29  ;;  %1504 = vmatprep.subr.bf16.mxu1 %v3008_v45 }
 0x422   : > { %1464 = vmatpush1.bf16.msra.mxu0 %v3012_v46  ;;  %1505 = vmatpush1.bf16.msra.mxu1 %v3020_v48 }
 0x423   : > { %1465 = vmatprep.subr.bf16.mxu0 %v3016_v47  ;;  %1506 = vmatprep.subr.bf16.mxu1 %v3024_v49 }
 0x426   : > { %1466 = vmatpush1.bf16.msra.mxu0 %v3028_v50  ;;  %1507 = vmatpush1.bf16.msra.mxu1 %v3036_v52 }
 0x427   : > { %1467 = vmatprep.subr.bf16.mxu0 %v3032_v51  ;;  %1508 = vmatprep.subr.bf16.mxu1 %v3040_v53 }
 0x42a   : > { %1468 = vmatpush1.bf16.msra.mxu0 %v3044_v54  ;;  %1509 = vmatpush1.bf16.msra.mxu1 %v3052_v56 }
 0x42b   : > { %1469 = vmatprep.subr.bf16.mxu0 %v3048_v55  ;;  %1510 = vmatprep.subr.bf16.mxu1 %v3056_v57 }
 0x42e   : > { %1470 = vmatpush1.bf16.msra.mxu0 %v3060_v58  ;;  %1511 = vmatpush1.bf16.msra.mxu1 %v3068_v60 }
 0x42f   : > { %1471 = vmatprep.subr.bf16.mxu0 %v3064_v59  ;;  %1512 = vmatprep.subr.bf16.mxu1 %v3072_v61 }
 0x432   : > { %1472 = vmatpush1.bf16.msra.mxu0 %v3076_v62  ;;  %1513 = vmatpush1.bf16.msra.mxu1 %v3081_v63 }
 0x433   : > { %1571 = vmatprep.subr.bf16.mxu0 %v2957_v35  ;;  %1612 = vmatprep.subr.bf16.mxu1 %v2966_v38 }
 0x4e8   : > { %v1377_v10 = vpop.f32.mrb[8].mxu0  ;;  %v1418_v11 = vpop.f32.mrb[8].mxu1 }
 0x4e9   : > { %v1425_v12 = vadd.f32 %v1377_v10, %v1338_v40  ;;  %v1379_v13 = vpop.f32.mrb[9].mxu0  ;;  %v1420_v14 = vpop.f32.mrb[9].mxu1  ;;  %v1427_v33 = vadd.f32 %v1418_v11, %v1340_v32 }
 0x4ea   : > { %v1426_v15 = vadd.f32 %v1379_v13, %v1339_v9  ;;  %v1381_v17 = vpop.f32.mrb[10].mxu0  ;;  %v1422_v18 = vpop.f32.mrb[10].mxu1  ;;  %v1428_v31 = vadd.f32 %v1420_v14, %v1341_v16  ;;  %v1453_v13 = vld [vmem:[#allocation3 + $0x68] sm:$0xff] }
 0x4eb   : > { %v1429_v19 = vmul.f32 0.5, %v1425_v12  ;;  %v1382_v20 = vpop.f32.mrb[11].mxu0  ;;  %v1423_v21 = vpop.f32.mrb[11].mxu1  ;;  %v1431_v34 = vmul.f32 0.5, %v1427_v33 }
 0x4ec   : > { %v1430_v22 = vmul.f32 0.5, %v1426_v15  ;;  %v1455_v20 = vld [vmem:[#allocation3 + $0x78] sm:$0xff] }
 0x4ed   : > { %2377 = vtanh.f32 %v1429_v19 }
 0x4ee   : > { %2379 = vtanh.f32 %v1430_v22 }
 0x4ef   : > { %2381 = vtanh.f32 %v1428_v31 }
 0x4f0   : > { %2383 = vtanh.f32 %v1431_v34 }
 0x4f7   : > { %v2378_v39 = vpop.eup %2377 }
 0x4f8   : > { %v1435_v41 = vmul.f32 0.5, %v2378_v39  ;;  %v2380_v42 = vpop.eup %2379 }
 0x4f9   : > { %v1436_v1 = vmul.f32 0.5, %v2380_v42  ;;  %v2382_v3 = vpop.eup %2381 }
 0x4fa   : > { %v1438_v0 = vadd.f32 0.5, %v1435_v41  ;;  %v2384_v8 = vpop.eup %2383  ;;  %v1454_v41 = vld [vmem:[#allocation3 + $0x70] sm:$0xff] }
 0x4fb   : > { %v1439_v4 = vadd.f32 0.5, %v1436_v1  ;;  %v1437_v40 = vmul.f32 0.5, %v2384_v8 }
 0x4fc   : > { %v1443_v5 = vmul.f32 %v2382_v3, %v1438_v0 }
 0x4fd   : > { %v1442_v6 = vmul.f32 %v1439_v4, %v3162_v2  ;;  %v1440_v9 = vadd.f32 0.5, %v1437_v40  ;;  %v1452_v2 = vld [vmem:[#allocation3 + $0x60] sm:$0xff] }
 0x4ff   : > { %v3200_v7 = vadd.f32 %v1443_v5, %v1442_v6 }
 0x501   : > { %2385 = vtanh.f32 %v3200_v7 }
 0x50b   : > { %v2386_v10 = vpop.eup %2385 }
 0x50c   : > { %v1446_v11 = vmul.f32 %v2386_v10, %v1440_v9 }
 0x50e   : > { %1448 = vst [vmem:[#allocation2 + $0x10] sm:$0xff] %v1446_v11  ;;  %v1456_v12 = vpack.c.bf16 %v1446_v11, %v1446_v11 }
 0x510   : > { %1490 = vmatmul.mubr.bf16.vlgmr.msra.gmra.mrb[12].mxu0 %v1456_v12  ;;  %1531 = vmatmul.mubr.bf16.vlgmr.msra.gmra.mrb[12].mxu1 %v1456_v12 }
 0x511   : > { %1572 = vmatpush1.bf16.msra.mxu0 %v2960_v36  ;;  %1613 = vmatpush1.bf16.msra.mxu1 %v2973_v44 }
 0x512   : > { %1573 = vmatprep.subr.bf16.mxu0 %v2970_v43  ;;  %1614 = vmatprep.subr.bf16.mxu1 %v2980_v24 }
 0x513   : > { %1603 = vmatprep.mubr.bf16.mxu0 %v2566_v37  ;;  %1644 = vmatprep.mubr.bf16.mxu1 %v2566_v37 }
 0x515   : > { %1574 = vmatpush1.bf16.msra.mxu0 %v2976_v23  ;;  %1615 = vmatpush1.bf16.msra.mxu1 %v2989_v26 }
 0x516   : > { %1575 = vmatprep.subr.bf16.mxu0 %v2985_v25  ;;  %1616 = vmatprep.subr.bf16.mxu1 %v2996_v28 }
 0x519   : > { %1576 = vmatpush1.bf16.msra.mxu0 %v2992_v27  ;;  %1617 = vmatpush1.bf16.msra.mxu1 %v3004_v30 }
 0x51a   : > { %1577 = vmatprep.subr.bf16.mxu0 %v3000_v29  ;;  %1618 = vmatprep.subr.bf16.mxu1 %v3008_v45 }
 0x51d   : > { %1578 = vmatpush1.bf16.msra.mxu0 %v3012_v46  ;;  %1619 = vmatpush1.bf16.msra.mxu1 %v3020_v48 }
 0x51e   : > { %1579 = vmatprep.subr.bf16.mxu0 %v3016_v47  ;;  %1620 = vmatprep.subr.bf16.mxu1 %v3024_v49 }
 0x521   : > { %1580 = vmatpush1.bf16.msra.mxu0 %v3028_v50  ;;  %1621 = vmatpush1.bf16.msra.mxu1 %v3036_v52 }
 0x522   : > { %1581 = vmatprep.subr.bf16.mxu0 %v3032_v51  ;;  %1622 = vmatprep.subr.bf16.mxu1 %v3040_v53 }
 0x525   : > { %1582 = vmatpush1.bf16.msra.mxu0 %v3044_v54  ;;  %1623 = vmatpush1.bf16.msra.mxu1 %v3052_v56 }
 0x526   : > { %1583 = vmatprep.subr.bf16.mxu0 %v3048_v55  ;;  %1624 = vmatprep.subr.bf16.mxu1 %v3056_v57 }
 0x529   : > { %1584 = vmatpush1.bf16.msra.mxu0 %v3060_v58  ;;  %1625 = vmatpush1.bf16.msra.mxu1 %v3068_v60 }
 0x52a   : > { %1585 = vmatprep.subr.bf16.mxu0 %v3064_v59  ;;  %1626 = vmatprep.subr.bf16.mxu1 %v3072_v61 }
 0x52d   : > { %1586 = vmatpush1.bf16.msra.mxu0 %v3076_v62  ;;  %1627 = vmatpush1.bf16.msra.mxu1 %v3081_v63 }
 0x52e   : > { %1685 = vmatprep.subr.bf16.mxu0 %v2957_v35  ;;  %1726 = vmatprep.subr.bf16.mxu1 %v2966_v38 }
 0x5e3   : > { %v1491_v14 = vpop.f32.mrb[12].mxu0  ;;  %v1532_v15 = vpop.f32.mrb[12].mxu1 }
 0x5e4   : > { %v1539_v16 = vadd.f32 %v1491_v14, %v1452_v2  ;;  %v1493_v17 = vpop.f32.mrb[13].mxu0  ;;  %v1534_v18 = vpop.f32.mrb[13].mxu1  ;;  %v1541_v42 = vadd.f32 %v1532_v15, %v1454_v41 }
 0x5e5   : > { %v1540_v19 = vadd.f32 %v1493_v17, %v1453_v13  ;;  %v1495_v21 = vpop.f32.mrb[14].mxu0  ;;  %v1536_v22 = vpop.f32.mrb[14].mxu1  ;;  %v1542_v39 = vadd.f32 %v1534_v18, %v1455_v20  ;;  %v1567_v17 = vld [vmem:[#allocation3 + $0x88] sm:$0xff] }
 0x5e6   : > { %v1543_v31 = vmul.f32 0.5, %v1539_v16  ;;  %v1496_v32 = vpop.f32.mrb[15].mxu0  ;;  %v1537_v33 = vpop.f32.mrb[15].mxu1  ;;  %v1545_v0 = vmul.f32 0.5, %v1541_v42 }
 0x5e7   : > { %v1544_v34 = vmul.f32 0.5, %v1540_v19  ;;  %v1569_v32 = vld [vmem:[#allocation3 + $0x98] sm:$0xff] }
 0x5e8   : > { %2387 = vtanh.f32 %v1543_v31 }
 0x5e9   : > { %2389 = vtanh.f32 %v1544_v34 }
 0x5ea   : > { %2391 = vtanh.f32 %v1542_v39 }
 0x5eb   : > { %2393 = vtanh.f32 %v1545_v0 }
 0x5f2   : > { %v2388_v1 = vpop.eup %2387 }
 0x5f3   : > { %v1549_v3 = vmul.f32 0.5, %v2388_v1  ;;  %v2390_v4 = vpop.eup %2389 }
 0x5f4   : > { %v1550_v6 = vmul.f32 0.5, %v2390_v4  ;;  %v2392_v8 = vpop.eup %2391 }
 0x5f5   : > { %v1552_v5 = vadd.f32 0.5, %v1549_v3  ;;  %v2394_v12 = vpop.eup %2393 }
 0x5f6   : > { %v1553_v40 = vadd.f32 0.5, %v1550_v6  ;;  %v1551_v2 = vmul.f32 0.5, %v2394_v12 }
 0x5f7   : > { %v1557_v9 = vmul.f32 %v2392_v8, %v1552_v5 }
 0x5f8   : > { %v1556_v10 = vmul.f32 %v1553_v40, %v3200_v7  ;;  %v1554_v13 = vadd.f32 0.5, %v1551_v2  ;;  %v1566_v7 = vld [vmem:[#allocation3 + $0x80] sm:$0xff] }
 0x5fa   : > { %v3238_v11 = vadd.f32 %v1557_v9, %v1556_v10 }
 0x5fc   : > { %2395 = vtanh.f32 %v3238_v11 }
 0x606   : > { %v2396_v14 = vpop.eup %2395 }
 0x607   : > { %v1560_v15 = vmul.f32 %v2396_v14, %v1554_v13 }
 0x609   : > { %1562 = vst [vmem:[#allocation2 + $0x18] sm:$0xff] %v1560_v15  ;;  %v1570_v16 = vpack.c.bf16 %v1560_v15, %v1560_v15 }
 0x60b   : > { %1604 = vmatmul.mubr.bf16.vlgmr.msra.gmra.mrb[16].mxu0 %v1570_v16  ;;  %1645 = vmatmul.mubr.bf16.vlgmr.msra.gmra.mrb[16].mxu1 %v1570_v16 }
 0x60c   : > { %1686 = vmatpush1.bf16.msra.mxu0 %v2960_v36  ;;  %1727 = vmatpush1.bf16.msra.mxu1 %v2973_v44 }
 0x60d   : > { %1687 = vmatprep.subr.bf16.mxu0 %v2970_v43  ;;  %1728 = vmatprep.subr.bf16.mxu1 %v2980_v24 }
 0x60e   : > { %1717 = vmatprep.mubr.bf16.mxu0 %v2566_v37  ;;  %1758 = vmatprep.mubr.bf16.mxu1 %v2566_v37 }
 0x610   : > { %1688 = vmatpush1.bf16.msra.mxu0 %v2976_v23  ;;  %1729 = vmatpush1.bf16.msra.mxu1 %v2989_v26 }
 0x611   : > { %1689 = vmatprep.subr.bf16.mxu0 %v2985_v25  ;;  %1730 = vmatprep.subr.bf16.mxu1 %v2996_v28 }
 0x614   : > { %1690 = vmatpush1.bf16.msra.mxu0 %v2992_v27  ;;  %1731 = vmatpush1.bf16.msra.mxu1 %v3004_v30 }
 0x615   : > { %1691 = vmatprep.subr.bf16.mxu0 %v3000_v29  ;;  %1732 = vmatprep.subr.bf16.mxu1 %v3008_v45 }
 0x618   : > { %1692 = vmatpush1.bf16.msra.mxu0 %v3012_v46  ;;  %1733 = vmatpush1.bf16.msra.mxu1 %v3020_v48 }
 0x619   : > { %1693 = vmatprep.subr.bf16.mxu0 %v3016_v47  ;;  %1734 = vmatprep.subr.bf16.mxu1 %v3024_v49 }
 0x61c   : > { %1694 = vmatpush1.bf16.msra.mxu0 %v3028_v50  ;;  %1735 = vmatpush1.bf16.msra.mxu1 %v3036_v52 }
 0x61d   : > { %1695 = vmatprep.subr.bf16.mxu0 %v3032_v51  ;;  %1736 = vmatprep.subr.bf16.mxu1 %v3040_v53 }
 0x620   : > { %1696 = vmatpush1.bf16.msra.mxu0 %v3044_v54  ;;  %1737 = vmatpush1.bf16.msra.mxu1 %v3052_v56 }
 0x621   : > { %1697 = vmatprep.subr.bf16.mxu0 %v3048_v55  ;;  %1738 = vmatprep.subr.bf16.mxu1 %v3056_v57 }
 0x624   : > { %1698 = vmatpush1.bf16.msra.mxu0 %v3060_v58  ;;  %1739 = vmatpush1.bf16.msra.mxu1 %v3068_v60 }
 0x625   : > { %1699 = vmatprep.subr.bf16.mxu0 %v3064_v59  ;;  %1740 = vmatprep.subr.bf16.mxu1 %v3072_v61 }
 0x628   : > { %1700 = vmatpush1.bf16.msra.mxu0 %v3076_v62  ;;  %1741 = vmatpush1.bf16.msra.mxu1 %v3081_v63 }
 0x629   : > { %1799 = vmatprep.subr.bf16.mxu0 %v2957_v35  ;;  %1840 = vmatprep.subr.bf16.mxu1 %v2966_v38  ;;  %v1568_v35 = vld [vmem:[#allocation3 + $0x90] sm:$0xff] }
 0x6de   : > { %v1605_v18 = vpop.f32.mrb[16].mxu0  ;;  %v1646_v19 = vpop.f32.mrb[16].mxu1 }
 0x6df   : > { %v1653_v20 = vadd.f32 %v1605_v18, %v1566_v7  ;;  %v1607_v21 = vpop.f32.mrb[17].mxu0  ;;  %v1648_v22 = vpop.f32.mrb[17].mxu1  ;;  %v1655_v3 = vadd.f32 %v1646_v19, %v1568_v35  ;;  %v2438_v35 = vld [vmem:[%s2753_s16] ss:$16 sps:$4 sm:$0xff]  }
 0x6e0   : > { %v1654_v31 = vadd.f32 %v1607_v21, %v1567_v17  ;;  %v1609_v33 = vpop.f32.mrb[18].mxu0  ;;  %v1650_v34 = vpop.f32.mrb[18].mxu1  ;;  %v1656_v1 = vadd.f32 %v1648_v22, %v1569_v32 }
 0x6e1   : > { %v1657_v39 = vmul.f32 0.5, %v1653_v20  ;;  %v1610_v41 = vpop.f32.mrb[19].mxu0  ;;  %v1651_v42 = vpop.f32.mrb[19].mxu1  ;;  %v1659_v4 = vmul.f32 0.5, %v1655_v3  ;;  %v2439_v3 = vld [vmem:[%s2753_s16 + $0x8] ss:$16 sps:$4 sm:$0xff]  }
 0x6e2   : > { %v1658_v0 = vmul.f32 0.5, %v1654_v31 }
 0x6e3   : > { %2397 = vtanh.f32 %v1657_v39 }
 0x6e4   : > { %2399 = vtanh.f32 %v1658_v0 }
 0x6e5   : > { %2401 = vtanh.f32 %v1656_v1 }
 0x6e6   : > { %2403 = vtanh.f32 %v1659_v4  ;;  %v2440_v4 = vld [vmem:[%s2753_s16 + $0x24] ss:$16 sps:$4 sm:$0xff]  }
 0x6ed   : > { %v2398_v5 = vpop.eup %2397 }
 0x6ee   : > { %v1663_v6 = vmul.f32 0.5, %v2398_v5  ;;  %v2400_v8 = vpop.eup %2399  ;;  %v2441_v5 = vld [vmem:[%s2753_s16 + $0x2c] ss:$16 sps:$4 sm:$0xff]  }
 0x6ef   : > { %v1664_v9 = vmul.f32 0.5, %v2400_v8  ;;  %v2402_v10 = vpop.eup %2401  ;;  %v2443_v8 = vld [vmem:[%s2753_s16 + $0x28] ss:$16 sps:$4 sm:$0xff]  }
 0x6f0   : > { %v1666_v40 = vadd.f32 0.5, %v1663_v6  ;;  %v2404_v15 = vpop.eup %2403  ;;  %v2442_v6 = vld [vmem:[%s2753_s16 + $0x20] ss:$16 sps:$4 sm:$0xff]  }
 0x6f1   : > { %v1667_v12 = vadd.f32 0.5, %v1664_v9  ;;  %v1665_v16 = vmul.f32 0.5, %v2404_v15  ;;  %v2445_v9 = vld [vmem:[%s2753_s16 + $0x4c] ss:$16 sps:$4 sm:$0xff]   ;;  %v2452_v15 = vld [vmem:[%s2753_s16 + $0x84] ss:$16 sps:$4 sm:$0xff]  }
 0x6f2   : > { %v1671_v2 = vmul.f32 %v2402_v10, %v1666_v40  ;;  %v2444_v40 = vld [vmem:[%s2753_s16 + $0x44] ss:$16 sps:$4 sm:$0xff]   ;;  %v2446_v10 = vld [vmem:[%s2753_s16 + $0x40] ss:$16 sps:$4 sm:$0xff]  }
 0x6f3   : > { %v1670_v13 = vmul.f32 %v1667_v12, %v3238_v11  ;;  %v1668_v7 = vadd.f32 0.5, %v1665_v16  ;;  %v2447_v12 = vld [vmem:[%s2753_s16 + $0x48] ss:$16 sps:$4 sm:$0xff]   ;;  %v2453_v16 = vld [vmem:[%s2753_s16 + $0x8c] ss:$16 sps:$4 sm:$0xff]  }
 0x6f5   : > { %v3276_v14 = vadd.f32 %v1671_v2, %v1670_v13  ;;  %v2448_v2 = vld [vmem:[%s2753_s16 + $0x64] ss:$16 sps:$4 sm:$0xff]   ;;  %v2450_v13 = vld [vmem:[%s2753_s16 + $0x60] ss:$16 sps:$4 sm:$0xff]  }
 0x6f7   : > { %2405 = vtanh.f32 %v3276_v14 }
 0x701   : > { %v2406_v17 = vpop.eup %2405 }
 0x702   : > { %v1674_v18 = vmul.f32 %v2406_v17, %v1668_v7  ;;  %v2454_v7 = vld [vmem:[%s2753_s16 + $0x80] ss:$16 sps:$4 sm:$0xff]   ;;  %v2455_v17 = vld [vmem:[%s2753_s16 + $0x88] ss:$16 sps:$4 sm:$0xff]  }
 0x704   : > { %1676 = vst [vmem:[#allocation2 + $0x20] sm:$0xff] %v1674_v18  ;;  %v1684_v19 = vpack.c.bf16 %v1674_v18, %v1674_v18  ;;  %v2456_v18 = vld [vmem:[%s2753_s16 + $0xa4] ss:$16 sps:$4 sm:$0xff]  }
 0x706   : > { %1718 = vmatmul.mubr.bf16.vlgmr.msra.gmra.mrb[20].mxu0 %v1684_v19  ;;  %1759 = vmatmul.mubr.bf16.vlgmr.msra.gmra.mrb[20].mxu1 %v1684_v19  ;;  %v2457_v19 = vld [vmem:[%s2753_s16 + $0xac] ss:$16 sps:$4 sm:$0xff]  }
 0x707   : > { %1800 = vmatpush1.bf16.msra.mxu0 %v2960_v36  ;;  %1841 = vmatpush1.bf16.msra.mxu1 %v2973_v44  ;;  %v2437_v36 = vld [vmem:[%s2753_s16 + $0x4] ss:$16 sps:$4 sm:$0xff]  }
 0x708   : > { %1801 = vmatprep.subr.bf16.mxu0 %v2970_v43  ;;  %1842 = vmatprep.subr.bf16.mxu1 %v2980_v24  ;;  %v1680_v43 = vld [vmem:[#allocation3 + $0xa0] sm:$0xff]  ;;  %v1681_v44 = vld [vmem:[#allocation3 + $0xa8] sm:$0xff] }
 0x709   : > { %1831 = vmatprep.mubr.bf16.mxu0 %v2566_v37  ;;  %1872 = vmatprep.mubr.bf16.mxu1 %v2566_v37 }
 0x70b   : > { %1802 = vmatpush1.bf16.msra.mxu0 %v2976_v23  ;;  %1843 = vmatpush1.bf16.msra.mxu1 %v2989_v26 }
 0x70c   : > { %1803 = vmatprep.subr.bf16.mxu0 %v2985_v25  ;;  %1844 = vmatprep.subr.bf16.mxu1 %v2996_v28 }
 0x70f   : > { %1804 = vmatpush1.bf16.msra.mxu0 %v2992_v27  ;;  %1845 = vmatpush1.bf16.msra.mxu1 %v3004_v30 }
 0x710   : > { %1805 = vmatprep.subr.bf16.mxu0 %v3000_v29  ;;  %1846 = vmatprep.subr.bf16.mxu1 %v3008_v45  ;;  %v1683_v29 = vld [vmem:[#allocation3 + $0xb8] sm:$0xff] }
 0x713   : > { %1806 = vmatpush1.bf16.msra.mxu0 %v3012_v46  ;;  %1847 = vmatpush1.bf16.msra.mxu1 %v3020_v48 }
 0x714   : > { %1807 = vmatprep.subr.bf16.mxu0 %v3016_v47  ;;  %1848 = vmatprep.subr.bf16.mxu1 %v3024_v49 }
 0x717   : > { %1808 = vmatpush1.bf16.msra.mxu0 %v3028_v50  ;;  %1849 = vmatpush1.bf16.msra.mxu1 %v3036_v52 }
 0x718   : > { %1809 = vmatprep.subr.bf16.mxu0 %v3032_v51  ;;  %1850 = vmatprep.subr.bf16.mxu1 %v3040_v53  ;;  %v1682_v51 = vld [vmem:[#allocation3 + $0xb0] sm:$0xff] }
 0x71b   : > { %1810 = vmatpush1.bf16.msra.mxu0 %v3044_v54  ;;  %1851 = vmatpush1.bf16.msra.mxu1 %v3052_v56 }
 0x71c   : > { %1811 = vmatprep.subr.bf16.mxu0 %v3048_v55  ;;  %1852 = vmatprep.subr.bf16.mxu1 %v3056_v57 }
 0x71f   : > { %1812 = vmatpush1.bf16.msra.mxu0 %v3060_v58  ;;  %1853 = vmatpush1.bf16.msra.mxu1 %v3068_v60 }
 0x720   : > { %1813 = vmatprep.subr.bf16.mxu0 %v3064_v59  ;;  %1854 = vmatprep.subr.bf16.mxu1 %v3072_v61 }
 0x723   : > { %1814 = vmatpush1.bf16.msra.mxu0 %v3076_v62  ;;  %1855 = vmatpush1.bf16.msra.mxu1 %v3081_v63 }
 0x724   : > { %1913 = vmatprep.subr.bf16.mxu0 %v2437_v36  ;;  %1954 = vmatprep.subr.bf16.mxu1 %v2966_v38  ;;  %v2458_v36 = vld [vmem:[%s2753_s16 + $0xa0] ss:$16 sps:$4 sm:$0xff]  }
 0x7d9   : > { %v1719_v23 = vpop.f32.mrb[20].mxu0  ;;  %v1760_v24 = vpop.f32.mrb[20].mxu1 }
 0x7da   : > { %v1767_v25 = vadd.f32 %v1719_v23, %v1680_v43  ;;  %v1721_v26 = vpop.f32.mrb[21].mxu0  ;;  %v1762_v27 = vpop.f32.mrb[21].mxu1  ;;  %v1769_v38 = vadd.f32 %v1760_v24, %v1682_v51  ;;  %v2459_v43 = vld [vmem:[%s2753_s16 + $0xc4] ss:$16 sps:$4 sm:$0xff]  }
 0x7db   : > { %v1768_v28 = vadd.f32 %v1721_v26, %v1681_v44  ;;  %v1723_v30 = vpop.f32.mrb[22].mxu0  ;;  %v1764_v45 = vpop.f32.mrb[22].mxu1  ;;  %v1770_v50 = vadd.f32 %v1762_v27, %v1683_v29  ;;  %v1794_v44 = vld [vmem:[#allocation3 + $0xc0] sm:$0xff]  ;;  %v1795_v23 = vld [vmem:[#allocation3 + $0xc8] sm:$0xff] }
 0x7dc   : > { %v1771_v46 = vmul.f32 0.5, %v1767_v25  ;;  %v1724_v47 = vpop.f32.mrb[23].mxu0  ;;  %v1765_v48 = vpop.f32.mrb[23].mxu1  ;;  %v1773_v52 = vmul.f32 0.5, %v1769_v38 }
 0x7dd   : > { %v1772_v49 = vmul.f32 0.5, %v1768_v28  ;;  %v1797_v28 = vld [vmem:[#allocation3 + $0xd8] sm:$0xff] }
 0x7de   : > { %2407 = vtanh.f32 %v1771_v46 }
 0x7df   : > { %2409 = vtanh.f32 %v1772_v49 }
 0x7e0   : > { %2411 = vtanh.f32 %v1770_v50 }
 0x7e1   : > { %2413 = vtanh.f32 %v1773_v52 }
 0x7e8   : > { %v2408_v53 = vpop.eup %2407 }
 0x7e9   : > { %v1777_v54 = vmul.f32 0.5, %v2408_v53  ;;  %v2410_v55 = vpop.eup %2409 }
 0x7ea   : > { %v1778_v20 = vmul.f32 0.5, %v2410_v55  ;;  %v2412_v21 = vpop.eup %2411 }
 0x7eb   : > { %v1780_v11 = vadd.f32 0.5, %v1777_v54  ;;  %v2414_v34 = vpop.eup %2413 }
 0x7ec   : > { %v1781_v22 = vadd.f32 0.5, %v1778_v20  ;;  %v1779_v39 = vmul.f32 0.5, %v2414_v34  ;;  %v1908_v34 = vld [vmem:[#allocation3 + $0xe0] sm:$0xff] }
 0x7ed   : > { %v1785_v31 = vmul.f32 %v2412_v21, %v1780_v11 }
 0x7ee   : > { %v1784_v32 = vmul.f32 %v1781_v22, %v3276_v14  ;;  %v1782_v41 = vadd.f32 0.5, %v1779_v39  ;;  %v2451_v14 = vld [vmem:[%s2753_s16 + $0x68] ss:$16 sps:$4 sm:$0xff]  }
 0x7ef   : > { %v1909_v39 = vld [vmem:[#allocation3 + $0xe8] sm:$0xff] }
 0x7f0   : > { %v3314_v33 = vadd.f32 %v1785_v31, %v1784_v32 }
 0x7f2   : > { %2415 = vtanh.f32 %v3314_v33 }
 0x7fc   : > { %v2416_v42 = vpop.eup %2415 }
 0x7fd   : > { %v1788_v0 = vmul.f32 %v2416_v42, %v1782_v41 }
 0x7ff   : > { %1790 = vst [vmem:[#allocation2 + $0x28] sm:$0xff] %v1788_v0  ;;  %v1798_v1 = vpack.c.bf16 %v1788_v0, %v1788_v0 }
 0x801   : > { %1832 = vmatmul.mubr.bf16.vlgmr.msra.gmra.mrb[24].mxu0 %v1798_v1  ;;  %1873 = vmatmul.mubr.bf16.vlgmr.msra.gmra.mrb[24].mxu1 %v1798_v1 }
 0x802   : > { %1914 = vmatpush1.bf16.msra.mxu0 %v2438_v35  ;;  %1955 = vmatpush1.bf16.msra.mxu1 %v2439_v3 }
 0x803   : > { %1915 = vmatprep.subr.bf16.mxu0 %v2440_v4  ;;  %1956 = vmatprep.subr.bf16.mxu1 %v2441_v5 }
 0x804   : > { %1945 = vmatprep.mubr.bf16.mxu0 %v2566_v37  ;;  %1986 = vmatprep.mubr.bf16.mxu1 %v2566_v37  ;;  %v2449_v37 = vld [vmem:[%s2753_s16 + $0x6c] ss:$16 sps:$4 sm:$0xff]  }
 0x806   : > { %1916 = vmatpush1.bf16.msra.mxu0 %v2442_v6  ;;  %1957 = vmatpush1.bf16.msra.mxu1 %v2443_v8 }
 0x807   : > { %1917 = vmatprep.subr.bf16.mxu0 %v2444_v40  ;;  %1958 = vmatprep.subr.bf16.mxu1 %v2445_v9 }
 0x80a   : > { %1918 = vmatpush1.bf16.msra.mxu0 %v2446_v10  ;;  %1959 = vmatpush1.bf16.msra.mxu1 %v2447_v12  ;;  %v1910_v12 = vld [vmem:[#allocation3 + $0xf0] sm:$0xff] }
 0x80b   : > { %1919 = vmatprep.subr.bf16.mxu0 %v2448_v2  ;;  %1960 = vmatprep.subr.bf16.mxu1 %v2449_v37 }
 0x80e   : > { %1920 = vmatpush1.bf16.msra.mxu0 %v2450_v13  ;;  %1961 = vmatpush1.bf16.msra.mxu1 %v2451_v14 }
 0x80f   : > { %1921 = vmatprep.subr.bf16.mxu0 %v2452_v15  ;;  %1962 = vmatprep.subr.bf16.mxu1 %v2453_v16 }
 0x812   : > { %1922 = vmatpush1.bf16.msra.mxu0 %v2454_v7  ;;  %1963 = vmatpush1.bf16.msra.mxu1 %v2455_v17 }
 0x813   : > { %1923 = vmatprep.subr.bf16.mxu0 %v2456_v18  ;;  %1964 = vmatprep.subr.bf16.mxu1 %v2457_v19 }
 0x816   : > { %1924 = vmatpush1.bf16.msra.mxu0 %v2458_v36  ;;  %1965 = vmatpush1.bf16.msra.mxu1 %v3052_v56 }
 0x817   : > { %1925 = vmatprep.subr.bf16.mxu0 %v2459_v43  ;;  %1966 = vmatprep.subr.bf16.mxu1 %v3056_v57 }
 0x81a   : > { %1926 = vmatpush1.bf16.msra.mxu0 %v3060_v58  ;;  %1967 = vmatpush1.bf16.msra.mxu1 %v3068_v60 }
 0x81b   : > { %1927 = vmatprep.subr.bf16.mxu0 %v3064_v59  ;;  %1968 = vmatprep.subr.bf16.mxu1 %v3072_v61 }
 0x81e   : > { %1928 = vmatpush1.bf16.msra.mxu0 %v3076_v62  ;;  %1969 = vmatpush1.bf16.msra.mxu1 %v3081_v63  ;;  %v1796_v62 = vld [vmem:[#allocation3 + $0xd0] sm:$0xff] }
 0x8d4   : > { %v1833_v24 = vpop.f32.mrb[24].mxu0  ;;  %v1874_v56 = vpop.f32.mrb[24].mxu1 }
 0x8d5   : > { %v1881_v25 = vadd.f32 %v1833_v24, %v1794_v44  ;;  %v1835_v26 = vpop.f32.mrb[25].mxu0  ;;  %v1876_v27 = vpop.f32.mrb[25].mxu1  ;;  %v1883_v63 = vadd.f32 %v1874_v56, %v1796_v62 }
 0x8d6   : > { %v1882_v57 = vadd.f32 %v1835_v26, %v1795_v23  ;;  %v1837_v58 = vpop.f32.mrb[26].mxu0  ;;  %v1878_v29 = vpop.f32.mrb[26].mxu1  ;;  %v1884_v61 = vadd.f32 %v1876_v27, %v1797_v28  ;;  %v2204_v26 = vld [vmem:[%s3374_s4] ss:$0 sm:$0xff] (!%p2203_p6) }
 0x8d7   : > { %v1885_v60 = vmul.f32 0.5, %v1881_v25  ;;  %v1838_v30 = vpop.f32.mrb[27].mxu0  ;;  %v1879_v59 = vpop.f32.mrb[27].mxu1  ;;  %v1887_v46 = vmul.f32 0.5, %v1883_v63 }
 0x8d8   : > { %v1886_v45 = vmul.f32 0.5, %v1882_v57  ;;  %v2205_v57 = vld [vmem:[#allocation4] ss:$0 sm:$0xff] (!%p2203_p6) }
 0x8d9   : > { %2417 = vtanh.f32 %v1885_v60 }
 0x8da   : > { %2419 = vtanh.f32 %v1886_v45 }
 0x8db   : > { %2421 = vtanh.f32 %v1884_v61 }
 0x8dc   : > { %2423 = vtanh.f32 %v1887_v46 }
 0x8e3   : > { %v2418_v47 = vpop.eup %2417 }
 0x8e4   : > { %v1891_v48 = vmul.f32 0.5, %v2418_v47  ;;  %v2420_v49 = vpop.eup %2419 }
 0x8e5   : > { %v1892_v51 = vmul.f32 0.5, %v2420_v49  ;;  %v2422_v38 = vpop.eup %2421 }
 0x8e6   : > { %v1894_v50 = vadd.f32 0.5, %v1891_v48  ;;  %v2424_v11 = vpop.eup %2423 }
 0x8e7   : > { %v1895_v52 = vadd.f32 0.5, %v1892_v51  ;;  %v1893_v20 = vmul.f32 0.5, %v2424_v11 }
 0x8e8   : > { %v1899_v53 = vmul.f32 %v2422_v38, %v1894_v50 }
 0x8e9   : > { %v1898_v54 = vmul.f32 %v1895_v52, %v3314_v33  ;;  %v1896_v21 = vadd.f32 0.5, %v1893_v20  ;;  %v1911_v33 = vld [vmem:[#allocation3 + $0xf8] sm:$0xff] }
 0x8eb   : > { %v1900_v55 = vadd.f32 %v1899_v53, %v1898_v54 }
 0x8ed   : > { %2425 = vtanh.f32 %v1900_v55 }
 0x8f7   : > { %v2426_v22 = vpop.eup %2425 }
 0x8f8   : > { %v1902_v31 = vmul.f32 %v2426_v22, %v1896_v21 }
 0x8fa   : > { %1904 = vst [vmem:[#allocation2 + $0x30] sm:$0xff] %v1902_v31  ;;  %v1912_v32 = vpack.c.bf16 %v1902_v31, %v1902_v31 }
 0x8fc   : > { %1946 = vmatmul.mubr.bf16.vlgmr.msra.gmra.mrb[28].mxu0 %v1912_v32  ;;  %1987 = vmatmul.mubr.bf16.vlgmr.msra.gmra.mrb[28].mxu1 %v1912_v32 }
 0x9cf   : > { %v1947_v41 = vpop.f32.mrb[28].mxu0  ;;  %v1988_v42 = vpop.f32.mrb[28].mxu1 }
 0x9d0   : > { %v1995_v0 = vadd.f32 %v1947_v41, %v1908_v34  ;;  %v1949_v1 = vpop.f32.mrb[29].mxu0  ;;  %v1990_v35 = vpop.f32.mrb[29].mxu1  ;;  %v1997_v2 = vadd.f32 %v1988_v42, %v1910_v12 }
 0x9d1   : > { %v1996_v3 = vadd.f32 %v1949_v1, %v1909_v39  ;;  %v1951_v4 = vpop.f32.mrb[30].mxu0  ;;  %v1992_v5 = vpop.f32.mrb[30].mxu1  ;;  %v1998_v10 = vadd.f32 %v1990_v35, %v1911_v33 }
 0x9d2   : > { %v1999_v6 = vmul.f32 0.5, %v1995_v0  ;;  %v1952_v8 = vpop.f32.mrb[31].mxu0  ;;  %v1993_v40 = vpop.f32.mrb[31].mxu1  ;;  %v2001_v37 = vmul.f32 0.5, %v1997_v2 }
 0x9d3   : > { %v2000_v9 = vmul.f32 0.5, %v1996_v3 }
 0x9d4   : > { %2427 = vtanh.f32 %v1999_v6 }
 0x9d5   : > { %2429 = vtanh.f32 %v2000_v9 }
 0x9d6   : > { %2431 = vtanh.f32 %v1998_v10 }
 0x9d7   : > { %2433 = vtanh.f32 %v2001_v37 }
 0x9de   : > { %v2428_v13 = vpop.eup %2427 }
 0x9df   : > { %v2005_v14 = vmul.f32 0.5, %v2428_v13  ;;  %v2430_v15 = vpop.eup %2429 }
 0x9e0   : > { %v2006_v7 = vmul.f32 0.5, %v2430_v15  ;;  %v2432_v17 = vpop.eup %2431 }
 0x9e1   : > { %v2008_v16 = vadd.f32 0.5, %v2005_v14  ;;  %v2434_v44 = vpop.eup %2433 }
 0x9e2   : > { %v2009_v18 = vadd.f32 0.5, %v2006_v7  ;;  %v2007_v23 = vmul.f32 0.5, %v2434_v44 }
 0x9e3   : > { %v2013_v19 = vmul.f32 %v2432_v17, %v2008_v16 }
 0x9e4   : > { %v2012_v36 = vmul.f32 %v2009_v18, %v1900_v55  ;;  %v2010_v24 = vadd.f32 0.5, %v2007_v23 }
 0x9e6   : > { %v2014_v43 = vadd.f32 %v2013_v19, %v2012_v36 }
 0x9e8   : > { %2435 = vtanh.f32 %v2014_v43 }
 0x9ef   : > { %2022 = sbr.rel (%p2203_p6) target bundleno = 2696 (0xa88), region = 64 }
 0x9f2   : > { %v2436_v56 = vpop.eup %2435 }
 0x9f3   : > { %v2016_v25 = vmul.f32 %v2436_v56, %v2010_v24 }
 0x9f5   : > { %2018 = vst [vmem:[#allocation2 + $0x38] sm:$0xff] %v2016_v25  ;;  %v2030_v27 = vmul.f32 (!%p2203_p6), %v2204_v26, %v2016_v25 }
 0x9f7   : > { %2031 = vadd.xlane.f32.xlu0 %v2030_v27 }
 0xa84   : > { %v2032_v28 = vpop.xlane.xlu0 %2031 }
 0xa85   : > { %v2040_v58 = vadd.f32 %v2205_v57, %v2032_v28 }
 0xa87   : > { %2042 = vst.msk [vmem:[%s3376_s6] sm:$0xff] %vm2041_vm0, %v2040_v58 }
 0xa88 PF: > { %p21_p1 = scmp.ge.s32.totalorder %s2627_s27, 6   ;;  %s3383_s23 = smov %s2550_s24 }
 0xa89   : > { %s3384_s24 = smov %s2554_s25  ;;  %s3385_s25 = smov %s2637_s30 }
 0xa8a   : > { %s3386_s26 = smov %s2627_s27  ;;  %23 = sbr.rel (!%p21_p1) target bundleno = 8 (0x8), region = 123 }
 0xa91   :  { %2054 = vsyncpa [#allocation6], 1 }
 0xa92   :  { %2056 = vsyncpa [#allocation6 + $0x1], 1 }
 0xa93   :  { %2057 = vsyncpa [#allocation8], 1 }
 0xa94   :  { %2059 = vsyncpa [#allocation8 + $0x1], 1 }

</bundles_post_ra>
